<compile_context>
chip_gen: v7x
topology: tpu7x:2x2x1
jax: 0.10.0
libtpu: 0.0.40
codegen_flags: <defaults>
</compile_context>

<pallas_src>
import numpy as np
import jax
import jax.numpy as jnp
from jax import lax
from jax.experimental import pallas as pl
from jax.experimental.pallas import tpu as pltpu


# ----------------------------- Pallas kernel ---------------------------------

def _msm_fused_kernel(x_ref, w1_ref, w2_ref, a_ref, o_ref, zstk_ref):
    # x_ref   : (1, S1, pp*Cin) f32   -- pooled-window taps folded into the contraction dim
    # w1_ref  : (pp*Cin, Cmid)  bf16  -- 1x1 conv weight replicated per pool tap, pre-scaled 1/pp
    # w2_ref  : (Cmid, 9*Cout)  bf16  -- 3x3 conv taps concatenated along N
    # a_ref   : (S2, 9*S1)      bf16  -- concatenated per-tap spatial ops, column = t*S1 + s
    # o_ref   : (1, S2, Cout)   f32
    # zstk_ref: (9*S1, Cout)    bf16  -- scratch: per-tap channel-mixed blocks stacked on rows
    s1 = x_ref.shape[1]
    cout = o_ref.shape[2]
    n_taps = w2_ref.shape[1] // cout

    # ReLU, then AvgPool + 1x1 conv as ONE bf16 MXU matmul (K = pp*Cin).
    xr = jnp.maximum(x_ref[0], 0.0).astype(jnp.bfloat16)
    y = jnp.dot(xr, w1_ref[...], preferred_element_type=jnp.float32)          # (S1, Cmid)

    # Channel mix for all 9 taps at the POOLED resolution (K = Cmid fills the MXU).
    z = jnp.dot(y.astype(jnp.bfloat16), w2_ref[...],
                preferred_element_type=jnp.float32)                           # (S1, 9*Cout)

    # Re-stack per-tap blocks onto the row axis (lane-aligned slices, 16-row aligned stores).
    for t in range(n_taps):
        zstk_ref[t * s1:(t + 1) * s1, :] = (
            z[:, t * cout:(t + 1) * cout].astype(jnp.bfloat16))

    # Apply all 9 spatial operators (shift @ bilinear-upsample) as ONE bf16 matmul, K = 9*S1.
    o_ref[0] = jnp.dot(a_ref[...], zstk_ref[...],
                       preferred_element_type=jnp.float32)                    # (S2, Cout)


# ----------------------------- operator builders ------------------------------

def _bilinear_matrix(out_size, in_size):
    # align_corners=True interpolation matrix (out_size, in_size)
    M = np.zeros((out_size, in_size), np.float32)
    for i in range(out_size):
        if in_size == 1 or out_size == 1:
            M[i, 0] = 1.0
            continue
        src = i * (in_size - 1) / (out_size - 1)
        i0 = min(int(np.floor(src)), in_size - 1)
        frac = src - i0
        i1 = min(i0 + 1, in_size - 1)
        M[i, i0] += 1.0 - frac
        M[i, i1] += frac
    return M


def _shift_matrix(H, W, dh, dw):
    # zero-padded spatial shift on row-major flattened (H*W) grid
    S = np.zeros((H * W, H * W), np.float32)
    for i in range(H):
        for j in range(W):
            ii, jj = i + dh, j + dw
            if 0 <= ii < H and 0 <= jj < W:
                S[i * W + j, ii * W + jj] = 1.0
    return S


# ----------------------------- wrapper ----------------------------------------

def msm_block_pallas(x_nchw, w_pool_conv, w_resize_conv, pool_size):
    N, Cin, H, W = x_nchw.shape
    p = pool_size
    Hp, Wp = H // p, W // p
    Ho, Wo = Hp * p, Wp * p
    S1, S2 = Hp * Wp, Ho * Wo
    Cmid = w_pool_conv.shape[0]
    Cout = w_resize_conv.shape[0]
    pp = p * p
    K1 = pp * Cin
    n_taps = 9

    # ---- layout prep (trace-time glue) ----
    x_nhwc = jnp.transpose(x_nchw, (0, 2, 3, 1))[:, :Ho, :Wo, :]   # AvgPool floor semantics
    x_blk = (x_nhwc.reshape(N, Hp, p, Wp, p, Cin)
             .transpose(0, 1, 3, 2, 4, 5)
             .reshape(N, S1, K1))                                  # pool taps folded into K

    # 1x1-conv weight with the average pooling folded in (bf16 MXU operand).
    w1 = jnp.transpose(w_pool_conv[:, :, 0, 0], (1, 0))            # (Cin, Cmid)
    w1_rep = (jnp.tile(w1, (pp, 1)) * (1.0 / pp)).astype(jnp.bfloat16)   # (pp*Cin, Cmid)

    # 3x3-conv taps concatenated along the output-channel axis (bf16 MXU operand).
    w2_np = np.asarray(w_resize_conv, np.float32)
    w2_cat = np.concatenate([w2_np[:, :, kh, kw].T                 # (Cmid, Cout) per tap
                             for kh in range(3) for kw in range(3)], axis=1)
    w2_cat = jnp.asarray(w2_cat).astype(jnp.bfloat16)              # (Cmid, 9*Cout)

    # Bilinear (align_corners=True) upsample + per-tap shift, concatenated along K:
    # column index = t*S1 + s  (matches the Z_stack row order built in the kernel).
    Uh = _bilinear_matrix(Ho, Hp)
    Uw = _bilinear_matrix(Wo, Wp)
    B = np.kron(Uh, Uw)                                            # (S2, S1)
    a_taps = np.stack([_shift_matrix(Ho, Wo, kh - 1, kw - 1) @ B
                       for kh in range(3) for kw in range(3)], 0)  # (9, S2, S1)
    a_cat = np.ascontiguousarray(a_taps.transpose(1, 0, 2)).reshape(S2, n_taps * S1)
    a_cat = jnp.asarray(a_cat).astype(jnp.bfloat16)                # (S2, 9*S1)
    # TODO(synk): for large H,W replace the dense kron operator (O((H*W)^2), VMEM hazard on
    # v7x's 64 MiB) with separable 1-D upsample matmuls + pltpu.roll-based 3x3 shifts.

    flops = int(2 * N * (S1 * K1 * Cmid + S1 * Cmid * n_taps * Cout
                         + S2 * n_taps * S1 * Cout))
    bytes_accessed = int(N * S1 * K1 * 4 + K1 * Cmid * 2 + Cmid * n_taps * Cout * 2
                         + S2 * n_taps * S1 * 2 + N * S2 * Cout * 4)

    out_flat = pl.pallas_call(
        _msm_fused_kernel,
        out_shape=jax.ShapeDtypeStruct((N, S2, Cout), jnp.float32),
        grid=(N,),
        in_specs=[pl.BlockSpec((1, S1, K1), lambda n: (n, 0, 0)),
                  pl.BlockSpec((K1, Cmid), lambda n: (0, 0)),
                  pl.BlockSpec((Cmid, n_taps * Cout), lambda n: (0, 0)),
                  pl.BlockSpec((S2, n_taps * S1), lambda n: (0, 0))],
        out_specs=pl.BlockSpec((1, S2, Cout), lambda n: (n, 0, 0)),
        scratch_shapes=[pltpu.VMEM((n_taps * S1, Cout), jnp.bfloat16)],
        compiler_params=pltpu.CompilerParams(dimension_semantics=("parallel",)),
        cost_estimate=pl.CostEstimate(flops=flops, transcendentals=0,
                                      bytes_accessed=bytes_accessed),
    )(x_blk, w1_rep, w2_cat, a_cat)

    # back to NCHW to match the PyTorch output convention
    return jnp.transpose(out_flat.reshape(N, Ho, Wo, Cout), (0, 3, 1, 2))


# ----------------------------- pure-JAX reference -----------------------------

def msm_block_reference(x_nchw, w_pool_conv, w_resize_conv, pool_size):
    p = pool_size
    N, C, H, W = x_nchw.shape
    Hp, Wp = H // p, W // p
    r = jnp.maximum(x_nchw, 0.0)[:, :, :Hp * p, :Wp * p]
    pooled = r.reshape(N, C, Hp, p, Wp, p).mean(axis=(3, 5))
    y = jnp.einsum('nchw,oc->nohw', pooled, w_pool_conv[:, :, 0, 0],
                   precision=lax.Precision.HIGHEST)
    Uh = jnp.asarray(_bilinear_matrix(Hp * p, Hp))
    Uw = jnp.asarray(_bilinear_matrix(Wp * p, Wp))
    u = jnp.einsum('nchw,ih,jw->ncij', y, Uh, Uw, precision=lax.Precision.HIGHEST)
    out = lax.conv_general_dilated(u, w_resize_conv, (1, 1), ((1, 1), (1, 1)),
                                   dimension_numbers=('NCHW', 'OIHW', 'NCHW'),
                                   precision=lax.Precision.HIGHEST)
    return out


# ----------------------------------- main -------------------------------------

if __name__ == "__main__":
    key = jax.random.PRNGKey(0)
    kx, k1, k2 = jax.random.split(key, 3)

    pool_size = 2
    x = jax.random.normal(kx, (2, 512, 8, 8), jnp.float32)                 # NCHW input
    w_pool_conv = 0.02 * jax.random.normal(k1, (256, 512, 1, 1), jnp.float32)
    w_resize_conv = 0.02 * jax.random.normal(k2, (256, 256, 3, 3), jnp.float32)

    out = msm_block_pallas(x, w_pool_conv, w_resize_conv, pool_size)
    out = jax.block_until_ready(out)

    ref = msm_block_reference(x, w_pool_conv, w_resize_conv, pool_size)
    # bf16 matmul operands with f32 accumulation -> slightly looser tolerance than pure f32.
    np.testing.assert_allclose(np.asarray(out), np.asarray(ref), atol=2e-2, rtol=2e-2)

    print("KERNEL_OK")
</pallas_src>

<mosaic_0001>
module attributes {stable_mosaic.version = 11 : i64} {
  func.func @_msm_fused_kernel(%arg0: i32, %arg1: memref<1x16x2048xf32, #tpu.memory_space<vmem>>, %arg2: memref<2048x256xbf16, #tpu.memory_space<vmem>>, %arg3: memref<256x2304xbf16, #tpu.memory_space<vmem>>, %arg4: memref<64x144xbf16, #tpu.memory_space<vmem>>, %arg5: memref<1x64x256xf32, #tpu.memory_space<vmem>>, %arg6: memref<144x256xbf16, #tpu.memory_space<vmem>>) attributes {dimension_semantics = [#tpu.dimension_semantics<parallel>], iteration_bounds = array<i64: 2>, scalar_prefetch = 0 : i64, scratch_operands = 1 : i64, tpu.core_type = #tpu.core_type<tc>, window_params = [{transform_indices = @transform_0, window_bounds = array<i64: 1, 16, 2048>}, {pipeline_mode = #tpu.pipeline_mode<synchronous>, transform_indices = @transform_1, window_bounds = array<i64: 2048, 256>}, {pipeline_mode = #tpu.pipeline_mode<synchronous>, transform_indices = @transform_2, window_bounds = array<i64: 256, 2304>}, {pipeline_mode = #tpu.pipeline_mode<synchronous>, transform_indices = @transform_3, window_bounds = array<i64: 64, 144>}, {transform_indices = @transform_4, window_bounds = array<i64: 1, 64, 256>}]} {
    %c0 = arith.constant 0 : index
    %c0_0 = arith.constant 0 : index
    %c0_1 = arith.constant 0 : index
    %0 = vector.load %arg1[%c0, %c0_0, %c0_1] : memref<1x16x2048xf32, #tpu.memory_space<vmem>>, vector<1x16x2048xf32>
    %1 = vector.shape_cast %0 : vector<1x16x2048xf32> to vector<16x2048xf32>
    %cst = arith.constant 0.000000e+00 : f32
    %2 = vector.broadcast %cst : f32 to vector<16x2048xf32>
    %3 = arith.maximumf %1, %2 : vector<16x2048xf32>
    %4 = arith.truncf %3 : vector<16x2048xf32> to vector<16x2048xbf16>
    %c0_2 = arith.constant 0 : index
    %c0_3 = arith.constant 0 : index
    %5 = vector.load %arg2[%c0_2, %c0_3] : memref<2048x256xbf16, #tpu.memory_space<vmem>>, vector<2048x256xbf16>
    %cst_4 = arith.constant dense<0.000000e+00> : vector<16x256xf32>
    %6 = tpu.matmul %4, %5, %cst_4 {dimension_numbers = #tpu.dot_dimension_numbers<[1], [0], [0], [1], [0, 0, 1, 1], [], []>} : vector<16x2048xbf16>, vector<2048x256xbf16>, vector<16x256xf32> -> vector<16x256xf32>
    %7 = arith.truncf %6 : vector<16x256xf32> to vector<16x256xbf16>
    %c0_5 = arith.constant 0 : index
    %c0_6 = arith.constant 0 : index
    %8 = vector.load %arg3[%c0_5, %c0_6] : memref<256x2304xbf16, #tpu.memory_space<vmem>>, vector<256x2304xbf16>
    %cst_7 = arith.constant dense<0.000000e+00> : vector<16x2304xf32>
    %9 = tpu.matmul %7, %8, %cst_7 {dimension_numbers = #tpu.dot_dimension_numbers<[1], [0], [0], [1], [0, 0, 1, 1], [], []>} : vector<16x256xbf16>, vector<256x2304xbf16>, vector<16x2304xf32> -> vector<16x2304xf32>
    %10 = vector.extract_strided_slice %9 {offsets = [0, 0], sizes = [16, 256], strides = [1, 1]} : vector<16x2304xf32> to vector<16x256xf32>
    %11 = arith.truncf %10 : vector<16x256xf32> to vector<16x256xbf16>
    %c0_8 = arith.constant 0 : index
    %c0_9 = arith.constant 0 : index
    %12 = vector.load %arg6[%c0_8, %c0_9] : memref<144x256xbf16, #tpu.memory_space<vmem>>, vector<16x256xbf16>
    tpu.vector_store %arg6[%c0_8, %c0_9], %11 {strides = array<i32>} : memref<144x256xbf16, #tpu.memory_space<vmem>>, vector<16x256xbf16>,
    %13 = vector.extract_strided_slice %9 {offsets = [0, 256], sizes = [16, 256], strides = [1, 1]} : vector<16x2304xf32> to vector<16x256xf32>
    %14 = arith.truncf %13 : vector<16x256xf32> to vector<16x256xbf16>
    %c16 = arith.constant 16 : index
    %c0_10 = arith.constant 0 : index
    %15 = vector.load %arg6[%c16, %c0_10] : memref<144x256xbf16, #tpu.memory_space<vmem>>, vector<16x256xbf16>
    tpu.vector_store %arg6[%c16, %c0_10], %14 {strides = array<i32>} : memref<144x256xbf16, #tpu.memory_space<vmem>>, vector<16x256xbf16>,
    %16 = vector.extract_strided_slice %9 {offsets = [0, 512], sizes = [16, 256], strides = [1, 1]} : vector<16x2304xf32> to vector<16x256xf32>
    %17 = arith.truncf %16 : vector<16x256xf32> to vector<16x256xbf16>
    %c32 = arith.constant 32 : index
    %c0_11 = arith.constant 0 : index
    %18 = vector.load %arg6[%c32, %c0_11] : memref<144x256xbf16, #tpu.memory_space<vmem>>, vector<16x256xbf16>
    tpu.vector_store %arg6[%c32, %c0_11], %17 {strides = array<i32>} : memref<144x256xbf16, #tpu.memory_space<vmem>>, vector<16x256xbf16>,
    %19 = vector.extract_strided_slice %9 {offsets = [0, 768], sizes = [16, 256], strides = [1, 1]} : vector<16x2304xf32> to vector<16x256xf32>
    %20 = arith.truncf %19 : vector<16x256xf32> to vector<16x256xbf16>
    %c48 = arith.constant 48 : index
    %c0_12 = arith.constant 0 : index
    %21 = vector.load %arg6[%c48, %c0_12] : memref<144x256xbf16, #tpu.memory_space<vmem>>, vector<16x256xbf16>
    tpu.vector_store %arg6[%c48, %c0_12], %20 {strides = array<i32>} : memref<144x256xbf16, #tpu.memory_space<vmem>>, vector<16x256xbf16>,
    %22 = vector.extract_strided_slice %9 {offsets = [0, 1024], sizes = [16, 256], strides = [1, 1]} : vector<16x2304xf32> to vector<16x256xf32>
    %23 = arith.truncf %22 : vector<16x256xf32> to vector<16x256xbf16>
    %c64 = arith.constant 64 : index
    %c0_13 = arith.constant 0 : index
    %24 = vector.load %arg6[%c64, %c0_13] : memref<144x256xbf16, #tpu.memory_space<vmem>>, vector<16x256xbf16>
    tpu.vector_store %arg6[%c64, %c0_13], %23 {strides = array<i32>} : memref<144x256xbf16, #tpu.memory_space<vmem>>, vector<16x256xbf16>,
    %25 = vector.extract_strided_slice %9 {offsets = [0, 1280], sizes = [16, 256], strides = [1, 1]} : vector<16x2304xf32> to vector<16x256xf32>
    %26 = arith.truncf %25 : vector<16x256xf32> to vector<16x256xbf16>
    %c80 = arith.constant 80 : index
    %c0_14 = arith.constant 0 : index
    %27 = vector.load %arg6[%c80, %c0_14] : memref<144x256xbf16, #tpu.memory_space<vmem>>, vector<16x256xbf16>
    tpu.vector_store %arg6[%c80, %c0_14], %26 {strides = array<i32>} : memref<144x256xbf16, #tpu.memory_space<vmem>>, vector<16x256xbf16>,
    %28 = vector.extract_strided_slice %9 {offsets = [0, 1536], sizes = [16, 256], strides = [1, 1]} : vector<16x2304xf32> to vector<16x256xf32>
    %29 = arith.truncf %28 : vector<16x256xf32> to vector<16x256xbf16>
    %c96 = arith.constant 96 : index
    %c0_15 = arith.constant 0 : index
    %30 = vector.load %arg6[%c96, %c0_15] : memref<144x256xbf16, #tpu.memory_space<vmem>>, vector<16x256xbf16>
    tpu.vector_store %arg6[%c96, %c0_15], %29 {strides = array<i32>} : memref<144x256xbf16, #tpu.memory_space<vmem>>, vector<16x256xbf16>,
    %31 = vector.extract_strided_slice %9 {offsets = [0, 1792], sizes = [16, 256], strides = [1, 1]} : vector<16x2304xf32> to vector<16x256xf32>
    %32 = arith.truncf %31 : vector<16x256xf32> to vector<16x256xbf16>
    %c112 = arith.constant 112 : index
    %c0_16 = arith.constant 0 : index
    %33 = vector.load %arg6[%c112, %c0_16] : memref<144x256xbf16, #tpu.memory_space<vmem>>, vector<16x256xbf16>
    tpu.vector_store %arg6[%c112, %c0_16], %32 {strides = array<i32>} : memref<144x256xbf16, #tpu.memory_space<vmem>>, vector<16x256xbf16>,
    %34 = vector.extract_strided_slice %9 {offsets = [0, 2048], sizes = [16, 256], strides = [1, 1]} : vector<16x2304xf32> to vector<16x256xf32>
    %35 = arith.truncf %34 : vector<16x256xf32> to vector<16x256xbf16>
    %c128 = arith.constant 128 : index
    %c0_17 = arith.constant 0 : index
    %36 = vector.load %arg6[%c128, %c0_17] : memref<144x256xbf16, #tpu.memory_space<vmem>>, vector<16x256xbf16>
    tpu.vector_store %arg6[%c128, %c0_17], %35 {strides = array<i32>} : memref<144x256xbf16, #tpu.memory_space<vmem>>, vector<16x256xbf16>,
    %c0_18 = arith.constant 0 : index
    %c0_19 = arith.constant 0 : index
    %37 = vector.load %arg4[%c0_18, %c0_19] : memref<64x144xbf16, #tpu.memory_space<vmem>>, vector<64x144xbf16>
    %c0_20 = arith.constant 0 : index
    %c0_21 = arith.constant 0 : index
    %38 = vector.load %arg6[%c0_20, %c0_21] : memref<144x256xbf16, #tpu.memory_space<vmem>>, vector<144x256xbf16>
    %cst_22 = arith.constant dense<0.000000e+00> : vector<64x256xf32>
    %39 = tpu.matmul %37, %38, %cst_22 {dimension_numbers = #tpu.dot_dimension_numbers<[1], [0], [0], [1], [0, 0, 1, 1], [], []>} : vector<64x144xbf16>, vector<144x256xbf16>, vector<64x256xf32> -> vector<64x256xf32>
    %c0_23 = arith.constant 0 : index
    %c0_24 = arith.constant 0 : index
    %c0_25 = arith.constant 0 : index
    %40 = vector.load %arg5[%c0_23, %c0_24, %c0_25] : memref<1x64x256xf32, #tpu.memory_space<vmem>>, vector<1x64x256xf32>
    %41 = vector.shape_cast %40 : vector<1x64x256xf32> to vector<64x256xf32>
    %42 = vector.shape_cast %39 : vector<64x256xf32> to vector<1x64x256xf32>
    tpu.vector_store %arg5[%c0_23, %c0_24, %c0_25], %42 {strides = array<i32>} : memref<1x64x256xf32, #tpu.memory_space<vmem>>, vector<1x64x256xf32>,
    return
  }
  func.func @transform_0(%arg0: i32) -> (i32, i32, i32) {
    %c0_i32 = arith.constant 0 : i32
    %c0_i32_0 = arith.constant 0 : i32
    %c0_i32_1 = arith.constant 0 : i32
    return %arg0, %c0_i32, %c0_i32_0 : i32, i32, i32
  }
  func.func @transform_1(%arg0: i32) -> (i32, i32) {
    %c0_i32 = arith.constant 0 : i32
    %c0_i32_0 = arith.constant 0 : i32
    %c0_i32_1 = arith.constant 0 : i32
    return %c0_i32, %c0_i32_0 : i32, i32
  }
  func.func @transform_2(%arg0: i32) -> (i32, i32) {
    %c0_i32 = arith.constant 0 : i32
    %c0_i32_0 = arith.constant 0 : i32
    %c0_i32_1 = arith.constant 0 : i32
    return %c0_i32, %c0_i32_0 : i32, i32
  }
  func.func @transform_3(%arg0: i32) -> (i32, i32) {
    %c0_i32 = arith.constant 0 : i32
    %c0_i32_0 = arith.constant 0 : i32
    %c0_i32_1 = arith.constant 0 : i32
    return %c0_i32, %c0_i32_0 : i32, i32
  }
  func.func @transform_4(%arg0: i32) -> (i32, i32, i32) {
    %c0_i32 = arith.constant 0 : i32
    %c0_i32_0 = arith.constant 0 : i32
    %c0_i32_1 = arith.constant 0 : i32
    return %arg0, %c0_i32, %c0_i32_0 : i32, i32, i32
  }
}

</mosaic_0001>

<bundles_post_ra>
// kernel: tpu_custom_call.1
= control target key start
LH: loop header
LB: loop body
LE: loop exit
PB: predicated region body
PF: predicated region fallthrough
CT: control target
= control target key end

     0   :  { %9 = vsyncpa [#allocation4], 0  ;;  %s6814_s0 = inlined_call_operand.hbm [shape: f32[2,16,2048], index: 0, kind: input, shape index: {}]   ;;  %s6815_s1 = inlined_call_operand.hbm [shape: bf16[2048,256], index: 1, kind: input, shape index: {}]   ;;  %s6816_s2 = inlined_call_operand.hbm [shape: bf16[256,2304], index: 2, kind: input, shape index: {}]   ;;  %s6817_s3 = inlined_call_operand.hbm [shape: bf16[64,144], index: 3, kind: input, shape index: {}]   ;;  %s6818_s4 = inlined_call_operand.hbm [shape: f32[2,64,256], index: 4, kind: output, shape index: {}]  }
   0x1   :  { %11 = vsyncpa [#allocation4 + $0x1], 0 }
   0x2   :  { %12 = vsyncpa [#allocation7], 0 }
   0x3   :  { %13 = vsyncpa [#allocation10], 0 }
   0x4   :  { %14 = vsyncpa [#allocation5], 0 }
   0x5   :  { %16 = vsyncpa [#allocation5 + $0x1], 0  ;;  %s6399_s15 = smov 0   ;;  %s6401_s16 = smov 0  }
   0x6   :  { %s6403_s17 = smov 0   ;;  %s6405_s18 = smov 0  }
   0x7 LB: > { %s6420_s19 = sadd.s32 4294967295, %s6360_s18   ;;  %s4654_s20 = sadd.s32 4294967294, %s6360_s18   ;;  %s6360_s18 = sphi %s6405_s18, %s6844_s18   ;;  %s6356_s17 = sphi %s6403_s17, %s6843_s17   ;;  %s6352_s16 = sphi %s6401_s16, %s6842_s16   ;;  %s6348_s15 = sphi %s6399_s15, %s6841_s15  }
   0x8   : > { %p42_p0 = scmp.ne.s32.totalorder %s6352_s16, %s6348_s15  ;;  %p6819_p1 = scmp.eq.s32.totalorder %s6420_s19, 0 }
   0x9   : > { %p135_p3 = scmp.eq.s32.totalorder %s4654_s20, 1  ;;  %p4655_p5 = scmp.ge.s32.totalorder %s6360_s18, 1 }
   0xa   : > { %p6429_p4 = por %p6819_p1, %p42_p0  ;;  %p142_p7 = scmp.lt.s32.totalorder %s6360_s18, 3 }
   0xb   : > { %p6434_p6 = por %p135_p3, %p42_p0  ;;  %s6362_s24 = smov [#allocation6]  }
   0xc   : > { %s6824_s21 = scalar_select %p6429_p4, 1, 0 }
   0xd   : > { %s6825_s22 = scalar_select %p6434_p6, 1, 0 }
   0xe   : > { %p6439_p8 = pnand %p4655_p5, %p142_p7  ;;  %s154_s25 = sshll.u32 %s6362_s24, 4  ;;  %s6443_s25 = int_to_ptr.vmem [resolvable:$true] %s154_s25 }
   0xf   : > { %s6363_s27 = smov [#allocation8]   ;;  %s6172_s5 = scalar_lea.hbm %s6815_s1, 32768 }
  0x10   : > { %s6826_s23 = scalar_select %p6439_p8, 1, 0 }
  0x11   : > { %p5276_p9 = pneg %p6439_p8  ;;  %s167_s28 = sshll.u32 %s6363_s27, 4  ;;  %s6454_s28 = int_to_ptr.vmem [resolvable:$true] %s167_s28 }
  0x12   : > { %p6173_p12 = scmp.ne.s32.totalorder %s6815_s1, %s6172_s5  ;;  %p6179_p5 = scmp.lt.u32.totalorder %s6172_s5, %s6815_s1 }
  0x13   : > { %p6450_p11 = pnand %p5276_p9, %p6819_p1 }
  0x15   : > { %p6464_p13 = pneg %p6450_p11 }
  0x17   : > { %p6175_p0 = pnand %p6464_p13, %p6173_p12 }
  0x19   : > { %p6176_p3 = pneg %p6175_p0 }
  0x1b   : > { %p6181_p7 = pnand %p6179_p5, %p6176_p3 }
  0x1d   : > { %6184 = shalt.err (!%p6181_p7)
}
  0x1e   : > { %s6185_s11 = scalar_lea.vmem %s6443_s25, 32768  ;;  %p6193_p2 = scmp.lt.s32.totalorder %s6443_s25, %s6443_s25 }
  0x1f   : > { %p6186_p9 = scmp.ne.s32.totalorder %s6443_s25, %s6185_s11  ;;  %p6194_p6 = scmp.lt.s32.totalorder %s6185_s11, %s6185_s11 }
  0x21   : > { %p6188_p10 = pnand %p6186_p9, %p6464_p13  ;;  %p6195_p12 = por %p6194_p6, %p6193_p2 }
  0x23   : > { %p6189_p1 = pneg %p6188_p10 }
  0x25   : > { %p6196_p0 = pnand %p6195_p12, %p6189_p1 }
  0x27   : > { %6199 = shalt.err (!%p6196_p0)
}
  0x28   : > { %s6820_s12 = smov 128   ;;  %s6365_s13 = smov 8  }
  0x29   : > { %5279 = dma.hbm_to_vmem [thread:$0]  (!%p6450_p11), %s6815_s1, 32768, %s6443_s25, [#allocation7], %s6820_s12, %s6820_s12, %s6365_s13  }
  0x2a   : > { %s6200_s29 = scalar_lea.hbm %s6816_s2, 36864 }
  0x2b   : > { %p6201_p1 = scmp.ne.s32.totalorder %s6816_s2, %s6200_s29  ;;  %p6207_p10 = scmp.lt.u32.totalorder %s6200_s29, %s6816_s2 }
  0x2d   : > { %p6203_p2 = pnand %p6201_p1, %p6464_p13 }
  0x2f   : > { %p6204_p6 = pneg %p6203_p2 }
  0x31   : > { %p6209_p3 = pnand %p6207_p10, %p6204_p6 }
  0x33   : > { %6212 = shalt.err (!%p6209_p3)
}
  0x34   : > { %s6213_s25 = scalar_lea.vmem %s6454_s28, 36864  ;;  %p6221_p12 = scmp.lt.s32.totalorder %s6454_s28, %s6454_s28 }
  0x35   : > { %p6214_p5 = scmp.ne.s32.totalorder %s6454_s28, %s6213_s25  ;;  %p6222_p0 = scmp.lt.s32.totalorder %s6213_s25, %s6213_s25 }
  0x37   : > { %p6216_p7 = pnand %p6214_p5, %p6464_p13  ;;  %p6223_p1 = por %p6222_p0, %p6221_p12 }
  0x39   : > { %p6217_p9 = pneg %p6216_p7 }
  0x3b   : > { %p6224_p2 = pnand %p6223_p1, %p6217_p9 }
  0x3d   : > { %6227 = shalt.err (!%p6224_p2)
}
  0x3e   : > { %s6366_s9 = smov 1152   ;;  %s6367_s10 = smov 72  }
  0x3f   : > { %5282 = dma.hbm_to_vmem [thread:$0]  (!%p6450_p11), %s6816_s2, 36864, %s6454_s28, [#allocation7], %s6366_s9, %s6366_s9, %s6367_s10  }
  0x40   : > { %s6368_s20 = smov [#allocation9]   ;;  %s6512_s27 = sadd.s32 1, %s6360_s18  }
  0x41   : > { %s180_s24 = sshll.u32 %s6368_s20, 4  ;;  %s6228_s5 = scalar_lea.hbm %s6817_s3, 1024  ;;  %s181_s24 = int_to_ptr.vmem [resolvable:$true] %s180_s24 }
  0x42   : > { %p6229_p6 = scmp.ne.s32.totalorder %s6817_s3, %s6228_s5  ;;  %p6235_p5 = scmp.lt.u32.totalorder %s6228_s5, %s6817_s3 }
  0x44   : > { %p6231_p10 = pnand %p6229_p6, %p6464_p13 }
  0x46   : > { %p6232_p3 = pneg %p6231_p10 }
  0x48   : > { %p6237_p7 = pnand %p6235_p5, %p6232_p3 }
  0x4a   : > { %6240 = shalt.err (!%p6237_p7)
}
  0x4b   : > { %s6241_s28 = scalar_lea.vmem %s181_s24, 1024  ;;  %p6249_p1 = scmp.lt.s32.totalorder %s181_s24, %s181_s24 }
  0x4c   : > { %p6242_p9 = scmp.ne.s32.totalorder %s181_s24, %s6241_s28  ;;  %p6250_p2 = scmp.lt.s32.totalorder %s6241_s28, %s6241_s28 }
  0x4e   : > { %p6244_p12 = pnand %p6242_p9, %p6464_p13  ;;  %p6251_p4 = por %p6250_p2, %p6249_p1 }
  0x50   : > { %p6245_p0 = pneg %p6244_p12 }
  0x52   : > { %p6252_p8 = pnand %p6251_p4, %p6245_p0 }
  0x54   : > { %6255 = shalt.err (!%p6252_p8)
}
  0x55   : > { %s6829_s9 = smov 128   ;;  %s26_s8 = ssub.s32 %s6360_s18, %s6512_s27 }
  0x56   : > { %5285 = dma.hbm_to_vmem [thread:$0]  (!%p6450_p11), %s6817_s3, 1024, %s181_s24, [#allocation10], %s6829_s9, %s6829_s9, %s6365_s13  }
  0x57   : > { %s29_s26 = sadd.s32 1, %s6356_s17  ;;  %p27_p4 = scmp.eq.s32.totalorder %s26_s8, 0 }
  0x58   : > { %p36_p8 = scmp.ne.s32.totalorder %s6356_s17, %s6352_s16  ;;  %p37_p13 = scmp.eq.s32.totalorder %s6360_s18, 0 }
  0x59   : > { %p5297_p6 = scmp.lt.s32.totalorder %s6360_s18, 2  ;;  %p6830_p3 = scmp.eq.s32.totalorder %s6420_s19, 1 }
  0x5a   : > { %s6543_s11 = scalar_select %p27_p4, %s6356_s17, %s29_s26  }
  0x5b   : > { %p38_p10 = por %p37_p13, %p36_p8  ;;  %p6547_p5 = por %p6830_p3, %p36_p8 }
  0x5c   : > { %s194_s20 = sand.u32 1, %s6356_s17   ;;  %s5230_s29 = sshll.u32 %s6360_s18, 12 }
  0x5d   : > { %s4660_s30 = sshll.u32 %s194_s20, 8  ;;  %s6556_s13 = scalar_lea.hbm %s6814_s0, %s5230_s29 }
  0x5e   : > { %s198_s24 = scalar_lea.vmem [#allocation3], %s4660_s30  ;;  %p6558_p11 = pnand %p5297_p6, %p38_p10 }
  0x5f   : > { %s205_s7 = sshll.u32 %s198_s24, 4  ;;  %s6564_s28 = scalar_lea.sflag [#allocation4], %s194_s20  ;;  %s6562_s7 = int_to_ptr.vmem [resolvable:$true] %s205_s7 }
  0x60   : > { %s6256_s12 = scalar_lea.hbm %s6556_s13, 4096  ;;  %p6258_p9 = pneg %p6558_p11 }
  0x61   : > { %p6257_p7 = scmp.ne.s32.totalorder %s6556_s13, %s6256_s12  ;;  %s6261_s26 = scalar_lea.hbm %s6814_s0, 8192 }
  0x62   : > { %p6262_p1 = scmp.lt.u32.totalorder %s6556_s13, %s6814_s0  ;;  %p6263_p2 = scmp.lt.u32.totalorder %s6261_s26, %s6256_s12 }
  0x63   : > { %p6259_p12 = pnand %p6258_p9, %p6257_p7  ;;  %p6265_p8 = scmp.lt.u32.totalorder %s6256_s12, %s6556_s13 }
  0x64   : > { %p6264_p4 = por %p6263_p2, %p6262_p1 }
  0x65   : > { %p6260_p0 = pneg %p6259_p12 }
  0x66   : > { %p6266_p13 = por %p6265_p8, %p6264_p4 }
  0x68   : > { %p6267_p6 = pnand %p6266_p13, %p6260_p0 }
  0x6a   : > { %6270 = shalt.err (!%p6267_p6)
}
  0x6b   : > { %s6271_s20 = scalar_lea.vmem %s6562_s7, 4096  ;;  %s6369_s5 = smov [#allocation3]  }
  0x6c   : > { %p6272_p10 = scmp.ne.s32.totalorder %s6562_s7, %s6271_s20  ;;  %s6276_s6 = sshll.u32 %s6369_s5, 4  ;;  %s6277_s6 = int_to_ptr.vmem [resolvable:$false] %s6276_s6 }
  0x6d   : > { %s6278_s24 = scalar_lea.vmem %s6277_s6, 8192  ;;  %p6279_p12 = scmp.lt.s32.totalorder %s6562_s7, %s6277_s6 }
  0x6e   : > { %p6274_p3 = pnand %p6272_p10, %p6258_p9  ;;  %p6280_p1 = scmp.lt.s32.totalorder %s6278_s24, %s6271_s20 }
  0x70   : > { %p6275_p7 = pneg %p6274_p3  ;;  %p6281_p2 = por %p6280_p1, %p6279_p12 }
  0x72   : > { %p6282_p4 = pnand %p6281_p2, %p6275_p7 }
  0x74   : > { %6285 = shalt.err (!%p6282_p4)
}
  0x75   : > { %s6370_s12 = smov 2048   ;;  %p6833_p9 = scmp.ne.s32.totalorder %s6826_s23, 0 }
  0x76   : > { %5289 = dma.hbm_to_vmem [thread:$0]  (!%p6558_p11), %s6556_s13, 4096, %s6562_s7, %s6564_s28, %s6370_s12, %s6370_s12, %s6829_s9  }
  0x77   : > { %217 = sbr.rel (%p6833_p9) target bundleno = 1792 (0x700), region = 36  ;;  %s6596_s10 = sand.u32 (!%p6833_p9), 1, %s6352_s16  }
  0x78   : > { %s4664_s8 = sshll.u32 (!%p6833_p9), %s6596_s10, 8  ;;  %s220_s26 = scalar_lea.sflag (!%p6833_p9), [#allocation4], %s6596_s10 }
  0x79   : > { %s6600_s29 = scalar_lea.vmem (!%p6833_p9), [#allocation3], %s4664_s8  ;;  %p6834_p0 = scmp.ne.s32.totalorder (!%p6833_p9), %s6824_s21, 0 }
  0x7e   : > { %6331 = dma.done.wait (%p6834_p0), %s220_s26, 4096  }
  0x7f   : > { %6333 = vsyncadd (%p6834_p0), %s220_s26, 4294963200  ;;  %p6835_p11 = scmp.eq.s32.totalorder %s6420_s19, 0 }
  0x81   : > { %6335 = dma.done.wait (%p6835_p11), [#allocation7], 69632   ;;  %p6836_p8 = pmov %p6835_p11 }
  0x83   : > { %6337 = vsyncadd (%p6836_p8), [#allocation7], 4294897664  ;;  %p6837_p13 = pmov %p6836_p8 }
  0x84   : > { %p6838_p6 = pmov %p6836_p8 }
  0x85   : > { %6339 = dma.done.wait (%p6837_p13), [#allocation10], 1024  }
  0x86   : > { %6341 = vsyncadd (%p6838_p6), [#allocation10], 4294966272  ;;  %v5344_v0 = vld [vmem:[#allocation6 + $0x4] ss:$8 sps:$4 sm:$0xff]   ;;  %v5346_v1 = vld [vmem:[#allocation6] ss:$8 sps:$4 sm:$0xff]  }
  0x87   : > { %1877 = vmatprep.subr.bf16.mxu0 %v5344_v0  ;;  %v5347_v2 = vld [vmem:[#allocation6 + $0x14] ss:$8 sps:$4 sm:$0xff]   ;;  %v5349_v3 = vld [vmem:[#allocation6 + $0x10] ss:$8 sps:$4 sm:$0xff]   ;;  %v5350_v4 = vld [vmem:[#allocation6 + $0x24] ss:$8 sps:$4 sm:$0xff]  }
  0x88   : > { %1878 = vmatpush1.bf16.msra.mxu0 %v5346_v1  ;;  %v5352_v5 = vld [vmem:[#allocation6 + $0x20] ss:$8 sps:$4 sm:$0xff]   ;;  %v5353_v6 = vld [vmem:[#allocation6 + $0x34] ss:$8 sps:$4 sm:$0xff]   ;;  %v5355_v7 = vld [vmem:[#allocation6 + $0x30] ss:$8 sps:$4 sm:$0xff]  }
  0x89   : > { %1879 = vmatprep.subr.bf16.mxu0 %v5347_v2  ;;  %v5356_v8 = vld [vmem:[#allocation6 + $0x44] ss:$8 sps:$4 sm:$0xff]   ;;  %v5358_v9 = vld [vmem:[#allocation6 + $0x40] ss:$8 sps:$4 sm:$0xff]   ;;  %v5359_v10 = vld [vmem:[#allocation6 + $0x54] ss:$8 sps:$4 sm:$0xff]  }
  0x8a   : > { %v5361_v11 = vld [vmem:[#allocation6 + $0x50] ss:$8 sps:$4 sm:$0xff]   ;;  %v5362_v12 = vld [vmem:[#allocation6 + $0x64] ss:$8 sps:$4 sm:$0xff]   ;;  %v5364_v17 = vld [vmem:[#allocation6 + $0x60] ss:$8 sps:$4 sm:$0xff]  }
  0x8b   : > { %v262_v13 = vld [vmem:[%s6600_s29 + $0x8] sm:$0xff]  ;;  %v5365_v18 = vld [vmem:[#allocation6 + $0x74] ss:$8 sps:$4 sm:$0xff]   ;;  %v5367_v20 = vld [vmem:[#allocation6 + $0x70] ss:$8 sps:$4 sm:$0xff]   ;;  %vm4436_vm0 = vcmask 130048  }
  0x8c   : > { %1880 = vmatpush1.bf16.msra.mxu0 %v5349_v3  ;;  %v278_v14 = vld [vmem:[%s6600_s29 + $0x88] sm:$0xff]  ;;  %v294_v15 = vmax.f32 %v262_v13, 0.0  ;;  %v5371_v23 = vld [vmem:[#allocation6 + $0x94] ss:$8 sps:$4 sm:$0xff]   ;;  %v5373_v24 = vld [vmem:[#allocation6 + $0x90] ss:$8 sps:$4 sm:$0xff]  }
  0x8d   : > { %1881 = vmatprep.subr.bf16.mxu0 %v5350_v4  ;;  %v310_v16 = vmax.f32 %v278_v14, 0.0  ;;  %v5368_v21 = vld [vmem:[#allocation6 + $0x84] ss:$8 sps:$4 sm:$0xff]   ;;  %v5370_v22 = vld [vmem:[#allocation6 + $0x80] ss:$8 sps:$4 sm:$0xff]   ;;  %v264_v38 = vld [vmem:[%s6600_s29 + $0x18] sm:$0xff] }
  0x8e   : > { %v5374_v25 = vld [vmem:[#allocation6 + $0xa4] ss:$8 sps:$4 sm:$0xff]   ;;  %v5376_v26 = vld [vmem:[#allocation6 + $0xa0] ss:$8 sps:$4 sm:$0xff]   ;;  %v5377_v27 = vld [vmem:[#allocation6 + $0xb4] ss:$8 sps:$4 sm:$0xff]  }
  0x8f   : > { %v326_v19 = vpack.c.bf16 %v310_v16, %v294_v15  ;;  %v5379_v28 = vld [vmem:[#allocation6 + $0xb0] ss:$8 sps:$4 sm:$0xff]   ;;  %v5380_v29 = vld [vmem:[#allocation6 + $0xc4] ss:$8 sps:$4 sm:$0xff]   ;;  %v5382_v30 = vld [vmem:[#allocation6 + $0xc0] ss:$8 sps:$4 sm:$0xff]  }
  0x90   : > { %1882 = vmatpush1.bf16.msra.mxu0 %v5352_v5  ;;  %v5383_v31 = vld [vmem:[#allocation6 + $0xd4] ss:$8 sps:$4 sm:$0xff]   ;;  %v5385_v32 = vld [vmem:[#allocation6 + $0xd0] ss:$8 sps:$4 sm:$0xff]   ;;  %v5386_v33 = vld [vmem:[#allocation6 + $0xe4] ss:$8 sps:$4 sm:$0xff]  }
  0x91   : > { %1883 = vmatprep.subr.bf16.mxu0 %v5353_v6  ;;  %1909 = vmatprep.mubr.bf16.mxu0 %v326_v19  ;;  %v5388_v34 = vld [vmem:[#allocation6 + $0xe0] ss:$8 sps:$4 sm:$0xff]   ;;  %v5389_v35 = vld [vmem:[#allocation6 + $0xf4] ss:$8 sps:$4 sm:$0xff]   ;;  %v5391_v42 = vld [vmem:[#allocation6 + $0xf0] ss:$8 sps:$4 sm:$0xff]  }
  0x92   : > { %v261_v36 = vld [vmem:[%s6600_s29] sm:$0xff]  ;;  %v280_v39 = vld [vmem:[%s6600_s29 + $0x98] sm:$0xff]  ;;  %v296_v43 = vmax.f32 %v264_v38, 0.0  ;;  %v263_v13 = vld [vmem:[%s6600_s29 + $0x10] sm:$0xff]  ;;  %s4668_s21 = sshll.u32 %s6596_s10, 7  ;;  %s5231_s9 = sshll.u32 %s6420_s19, 11 }
  0x93   : > { %v277_v37 = vld [vmem:[%s6600_s29 + $0x80] sm:$0xff]  ;;  %v293_v40 = vmax.f32 %v261_v36, 0.0  ;;  %v312_v44 = vmax.f32 %v280_v39, 0.0  ;;  %v5397_v49 = vld [vmem:[#allocation6 + $0x114] ss:$8 sps:$4 sm:$0xff]   ;;  %v266_v16 = vld [vmem:[%s6600_s29 + $0x28] sm:$0xff]  ;;  %s6765_s28 = scalar_lea.hbm %s6818_s4, %s5231_s9 }
  0x94   : > { %1884 = vmatpush1.bf16.msra.mxu0 %v5355_v7  ;;  %v309_v41 = vmax.f32 %v277_v37, 0.0  ;;  %v5394_v45 = vld [vmem:[#allocation6 + $0x104] ss:$8 sps:$4 sm:$0xff]   ;;  %v5392_v47 = vld [vmem:[#allocation6 + $0x100] ss:$8 sps:$4 sm:$0xff]   ;;  %v279_v14 = vld [vmem:[%s6600_s29 + $0x90] sm:$0xff] }
  0x95   : > { %1885 = vmatprep.subr.bf16.mxu0 %v5356_v8  ;;  %v328_v48 = vpack.c.bf16 %v312_v44, %v296_v43  ;;  %v5395_v50 = vld [vmem:[#allocation6 + $0x110] ss:$8 sps:$4 sm:$0xff]   ;;  %v5400_v51 = vld [vmem:[#allocation6 + $0x124] ss:$8 sps:$4 sm:$0xff]   ;;  %v5398_v52 = vld [vmem:[#allocation6 + $0x120] ss:$8 sps:$4 sm:$0xff]  }
  0x96   : > { %v325_v46 = vpack.c.bf16 %v309_v41, %v293_v40  ;;  %v5403_v53 = vld [vmem:[#allocation6 + $0x134] ss:$8 sps:$4 sm:$0xff]   ;;  %v5401_v54 = vld [vmem:[#allocation6 + $0x130] ss:$8 sps:$4 sm:$0xff]   ;;  %v5406_v55 = vld [vmem:[#allocation6 + $0x144] ss:$8 sps:$4 sm:$0xff]  }
  0x97   : > { %v5404_v56 = vld [vmem:[#allocation6 + $0x140] ss:$8 sps:$4 sm:$0xff]   ;;  %v5409_v57 = vld [vmem:[#allocation6 + $0x154] ss:$8 sps:$4 sm:$0xff]   ;;  %v5407_v58 = vld [vmem:[#allocation6 + $0x150] ss:$8 sps:$4 sm:$0xff]  }
  0x98   : > { %1886 = vmatpush1.bf16.msra.mxu0 %v5358_v9  ;;  %v5412_v59 = vld [vmem:[#allocation6 + $0x164] ss:$8 sps:$4 sm:$0xff]   ;;  %v5410_v60 = vld [vmem:[#allocation6 + $0x160] ss:$8 sps:$4 sm:$0xff]   ;;  %v5415_v61 = vld [vmem:[#allocation6 + $0x174] ss:$8 sps:$4 sm:$0xff]  }
  0x99   : > { %1887 = vmatprep.subr.bf16.mxu0 %v5359_v10  ;;  %v5413_v62 = vld [vmem:[#allocation6 + $0x170] ss:$8 sps:$4 sm:$0xff]   ;;  %v5418_v63 = vld [vmem:[#allocation6 + $0x184] ss:$8 sps:$4 sm:$0xff]   ;;  %v5416_v0 = vld [vmem:[#allocation6 + $0x180] ss:$8 sps:$4 sm:$0xff]  }
  0x9a   : > { %v5421_v1 = vld [vmem:[#allocation6 + $0x194] ss:$8 sps:$4 sm:$0xff]   ;;  %v5419_v2 = vld [vmem:[#allocation6 + $0x190] ss:$8 sps:$4 sm:$0xff]   ;;  %v5424_v3 = vld [vmem:[#allocation6 + $0x1a4] ss:$8 sps:$4 sm:$0xff]  }
  0x9b   : > { %v5422_v4 = vld [vmem:[#allocation6 + $0x1a0] ss:$8 sps:$4 sm:$0xff]   ;;  %v5427_v5 = vld [vmem:[#allocation6 + $0x1b4] ss:$8 sps:$4 sm:$0xff]   ;;  %v5425_v6 = vld [vmem:[#allocation6 + $0x1b0] ss:$8 sps:$4 sm:$0xff]  }
  0x9c   : > { %1888 = vmatpush1.bf16.msra.mxu0 %v5361_v11  ;;  %v5430_v7 = vld [vmem:[#allocation6 + $0x1c4] ss:$8 sps:$4 sm:$0xff]   ;;  %v5428_v8 = vld [vmem:[#allocation6 + $0x1c0] ss:$8 sps:$4 sm:$0xff]   ;;  %v5433_v9 = vld [vmem:[#allocation6 + $0x1d4] ss:$8 sps:$4 sm:$0xff]  }
  0x9d   : > { %1889 = vmatprep.subr.bf16.mxu0 %v5362_v12  ;;  %v5431_v10 = vld [vmem:[#allocation6 + $0x1d0] ss:$8 sps:$4 sm:$0xff]   ;;  %v5436_v11 = vld [vmem:[#allocation6 + $0x1e4] ss:$8 sps:$4 sm:$0xff]   ;;  %v5434_v12 = vld [vmem:[#allocation6 + $0x1e0] ss:$8 sps:$4 sm:$0xff]  }
  0x9e   : > { %v5439_v15 = vld [vmem:[#allocation6 + $0x1f4] ss:$8 sps:$4 sm:$0xff]   ;;  %v295_v19 = vmax.f32 %v263_v13, 0.0  ;;  %v5455_v36 = vld [vmem:[#allocation6 + $0x250] ss:$8 sps:$4 sm:$0xff]   ;;  %s6745_s23 = scalar_lea.vmem [#allocation11], %s4668_s21 }
  0x9f   : > { %v5460_v37 = vld [vmem:[#allocation6 + $0x264] ss:$8 sps:$4 sm:$0xff]   ;;  %v5458_v38 = vld [vmem:[#allocation6 + $0x260] ss:$8 sps:$4 sm:$0xff]   ;;  %v5463_v39 = vld [vmem:[#allocation6 + $0x274] ss:$8 sps:$4 sm:$0xff]  }
  0xa0   : > { %1890 = vmatpush1.bf16.msra.mxu0 %v5364_v17  ;;  %v282_v17 = vld [vmem:[%s6600_s29 + $0xa8] sm:$0xff]  ;;  %v5461_v40 = vld [vmem:[#allocation6 + $0x270] ss:$8 sps:$4 sm:$0xff]   ;;  %v5469_v43 = vld [vmem:[#allocation6 + $0x294] ss:$8 sps:$4 sm:$0xff]   ;;  %s4552_s13 = sshll.u32 %s6745_s23, 4  ;;  %s6767_s13 = int_to_ptr.vmem [resolvable:$true] %s4552_s13 }
  0xa1   : > { %1891 = vmatprep.subr.bf16.mxu0 %v5365_v18  ;;  %v5437_v18 = vld [vmem:[#allocation6 + $0x1f0] ss:$8 sps:$4 sm:$0xff]   ;;  %v5466_v41 = vld [vmem:[#allocation6 + $0x284] ss:$8 sps:$4 sm:$0xff]   ;;  %v5505_v13 = vld [vmem:[#allocation6 + $0x354] ss:$8 sps:$4 sm:$0xff]  }
  0xa2   : > { %v5467_v44 = vld [vmem:[#allocation6 + $0x290] ss:$8 sps:$4 sm:$0xff]   ;;  %s4539_s19 = scalar_lea.sflag [#allocation5], %s6596_s10  ;;  %s6286_s30 = scalar_lea.vmem %s6767_s13, 2048 }
  0xa3   : > { %p6287_p10 = scmp.ne.s32.totalorder %s6767_s13, %s6286_s30  ;;  %s6371_s20 = smov [#allocation11]  }
  0xa4   : > { %1892 = vmatpush1.bf16.msra.mxu0 %v5367_v20  ;;  %v311_v20 = vmax.f32 %v279_v14, 0.0  ;;  %v5503_v14 = vld [vmem:[#allocation6 + $0x350] ss:$8 sps:$4 sm:$0xff]   ;;  %s6290_s5 = sshll.u32 %s6371_s20, 4  ;;  %s6291_s5 = int_to_ptr.vmem [resolvable:$false] %s6290_s5 }
  0xa5   : > { %1893 = vmatprep.subr.bf16.mxu0 %v5368_v21  ;;  %v5442_v21 = vld [vmem:[#allocation6 + $0x204] ss:$8 sps:$4 sm:$0xff]   ;;  %p6288_p3 = pnand %p6287_p10, %p6547_p5  ;;  %s6292_s6 = scalar_lea.vmem %s6291_s5, 4096 }
  0xa6   : > { %p6293_p12 = scmp.lt.s32.totalorder %s6767_s13, %s6291_s5  ;;  %p6294_p1 = scmp.lt.s32.totalorder %s6292_s6, %s6286_s30 }
  0xa7   : > { %p6289_p7 = pneg %p6288_p3 }
  0xa8   : > { %1894 = vmatpush1.bf16.msra.mxu0 %v5370_v22  ;;  %v298_v22 = vmax.f32 %v266_v16, 0.0  ;;  %v5506_v16 = vld [vmem:[#allocation6 + $0x360] ss:$8 sps:$4 sm:$0xff]   ;;  %p6295_p2 = por %p6294_p1, %p6293_p12 }
  0xa9   : > { %1895 = vmatprep.subr.bf16.mxu0 %v5371_v23  ;;  %v314_v23 = vmax.f32 %v282_v17, 0.0  ;;  %v5511_v17 = vld [vmem:[#allocation6 + $0x374] ss:$8 sps:$4 sm:$0xff]  }
  0xaa   : > { %p6296_p4 = pnand %p6295_p2, %p6289_p7 }
  0xac   : > { %1896 = vmatpush1.bf16.msra.mxu0 %v5373_v24  ;;  %v327_v24 = vpack.c.bf16 %v311_v20, %v295_v19  ;;  %v5514_v19 = vld [vmem:[#allocation6 + $0x384] ss:$8 sps:$4 sm:$0xff]   ;;  %v5512_v20 = vld [vmem:[#allocation6 + $0x380] ss:$8 sps:$4 sm:$0xff]  }
  0xad   : > { %1897 = vmatprep.subr.bf16.mxu0 %v5374_v25  ;;  %v5440_v25 = vld [vmem:[#allocation6 + $0x200] ss:$8 sps:$4 sm:$0xff]  }
  0xb0   : > { %1898 = vmatpush1.bf16.msra.mxu0 %v5376_v26  ;;  %v5445_v26 = vld [vmem:[#allocation6 + $0x214] ss:$8 sps:$4 sm:$0xff]  }
  0xb1   : > { %1899 = vmatprep.subr.bf16.mxu0 %v5377_v27  ;;  %v330_v27 = vpack.c.bf16 %v314_v23, %v298_v22  ;;  %v5515_v22 = vld [vmem:[#allocation6 + $0x390] ss:$8 sps:$4 sm:$0xff]   ;;  %v5520_v23 = vld [vmem:[#allocation6 + $0x3a4] ss:$8 sps:$4 sm:$0xff]  }
  0xb4   : > { %1900 = vmatpush1.bf16.msra.mxu0 %v5379_v28  ;;  %v5443_v28 = vld [vmem:[#allocation6 + $0x210] ss:$8 sps:$4 sm:$0xff]  }
  0xb5   : > { %1901 = vmatprep.subr.bf16.mxu0 %v5380_v29  ;;  %v5448_v29 = vld [vmem:[#allocation6 + $0x224] ss:$8 sps:$4 sm:$0xff]  }
  0xb8   : > { %1902 = vmatpush1.bf16.msra.mxu0 %v5382_v30  ;;  %v5446_v30 = vld [vmem:[#allocation6 + $0x220] ss:$8 sps:$4 sm:$0xff]  }
  0xb9   : > { %1903 = vmatprep.subr.bf16.mxu0 %v5383_v31  ;;  %v5451_v31 = vld [vmem:[#allocation6 + $0x234] ss:$8 sps:$4 sm:$0xff]  }
  0xbc   : > { %1904 = vmatpush1.bf16.msra.mxu0 %v5385_v32  ;;  %v5449_v32 = vld [vmem:[#allocation6 + $0x230] ss:$8 sps:$4 sm:$0xff]  }
  0xbd   : > { %1905 = vmatprep.subr.bf16.mxu0 %v5386_v33  ;;  %v5454_v33 = vld [vmem:[#allocation6 + $0x244] ss:$8 sps:$4 sm:$0xff]  }
  0xc0   : > { %1906 = vmatpush1.bf16.msra.mxu0 %v5388_v34  ;;  %v5452_v34 = vld [vmem:[#allocation6 + $0x240] ss:$8 sps:$4 sm:$0xff]  }
  0xc1   : > { %1907 = vmatprep.subr.bf16.mxu0 %v5389_v35  ;;  %v5457_v35 = vld [vmem:[#allocation6 + $0x254] ss:$8 sps:$4 sm:$0xff]  }
  0xc4   : > { %1908 = vmatpush1.bf16.msra.mxu0 %v5391_v42  ;;  %v5464_v42 = vld [vmem:[#allocation6 + $0x280] ss:$8 sps:$4 sm:$0xff]  }
  0xc5   : > { %1920 = vmatprep.subr.bf16.mxu0 %v5394_v45  ;;  %v5472_v45 = vld [vmem:[#allocation6 + $0x2a4] ss:$8 sps:$4 sm:$0xff]  }
  0xc7   : > { %1910 = vmatmul.mubr.bf16.vlgmr.msra.gmra.mrb[0].mxu0 %v325_v46  ;;  %v5470_v46 = vld [vmem:[#allocation6 + $0x2a0] ss:$8 sps:$4 sm:$0xff]  }
  0xc8   : > { %1921 = vmatpush1.bf16.msra.mxu0 %v5392_v47  ;;  %1952 = vmatprep.mubr.bf16.mxu0 %v328_v48  ;;  %v5475_v47 = vld [vmem:[#allocation6 + $0x2b4] ss:$8 sps:$4 sm:$0xff]   ;;  %v5473_v48 = vld [vmem:[#allocation6 + $0x2b0] ss:$8 sps:$4 sm:$0xff]  }
  0xc9   : > { %1922 = vmatprep.subr.bf16.mxu0 %v5397_v49  ;;  %v5478_v49 = vld [vmem:[#allocation6 + $0x2c4] ss:$8 sps:$4 sm:$0xff]  }
  0xcc   : > { %1923 = vmatpush1.bf16.msra.mxu0 %v5395_v50  ;;  %v5476_v50 = vld [vmem:[#allocation6 + $0x2c0] ss:$8 sps:$4 sm:$0xff]  }
  0xcd   : > { %1924 = vmatprep.subr.bf16.mxu0 %v5400_v51  ;;  %v5481_v51 = vld [vmem:[#allocation6 + $0x2d4] ss:$8 sps:$4 sm:$0xff]  }
  0xd0   : > { %1925 = vmatpush1.bf16.msra.mxu0 %v5398_v52  ;;  %v5479_v52 = vld [vmem:[#allocation6 + $0x2d0] ss:$8 sps:$4 sm:$0xff]  }
  0xd1   : > { %1926 = vmatprep.subr.bf16.mxu0 %v5403_v53  ;;  %v5484_v53 = vld [vmem:[#allocation6 + $0x2e4] ss:$8 sps:$4 sm:$0xff]  }
  0xd4   : > { %1927 = vmatpush1.bf16.msra.mxu0 %v5401_v54  ;;  %v5482_v54 = vld [vmem:[#allocation6 + $0x2e0] ss:$8 sps:$4 sm:$0xff]  }
  0xd5   : > { %1928 = vmatprep.subr.bf16.mxu0 %v5406_v55  ;;  %v265_v55 = vld [vmem:[%s6600_s29 + $0x20] sm:$0xff] }
  0xd8   : > { %1929 = vmatpush1.bf16.msra.mxu0 %v5404_v56  ;;  %v281_v56 = vld [vmem:[%s6600_s29 + $0xa0] sm:$0xff] }
  0xd9   : > { %1930 = vmatprep.subr.bf16.mxu0 %v5409_v57  ;;  %v5487_v57 = vld [vmem:[#allocation6 + $0x2f4] ss:$8 sps:$4 sm:$0xff]  }
  0xdc   : > { %1931 = vmatpush1.bf16.msra.mxu0 %v5407_v58  ;;  %v268_v58 = vld [vmem:[%s6600_s29 + $0x38] sm:$0xff] }
  0xdd   : > { %1932 = vmatprep.subr.bf16.mxu0 %v5412_v59  ;;  %v284_v59 = vld [vmem:[%s6600_s29 + $0xb8] sm:$0xff] }
  0xe0   : > { %1933 = vmatpush1.bf16.msra.mxu0 %v5410_v60  ;;  %v5485_v60 = vld [vmem:[#allocation6 + $0x2f0] ss:$8 sps:$4 sm:$0xff]  }
  0xe1   : > { %1934 = vmatprep.subr.bf16.mxu0 %v5415_v61  ;;  %v297_v61 = vmax.f32 %v265_v55, 0.0  ;;  %v5553_v55 = vld [vmem:[#allocation6 + $0x454] ss:$8 sps:$4 sm:$0xff]  }
  0xe4   : > { %1935 = vmatpush1.bf16.msra.mxu0 %v5413_v62  ;;  %v313_v62 = vmax.f32 %v281_v56, 0.0  ;;  %v5551_v56 = vld [vmem:[#allocation6 + $0x450] ss:$8 sps:$4 sm:$0xff]  }
  0xe5   : > { %1936 = vmatprep.subr.bf16.mxu0 %v5418_v63  ;;  %v5490_v63 = vld [vmem:[#allocation6 + $0x304] ss:$8 sps:$4 sm:$0xff]  }
  0xe8   : > { %1937 = vmatpush1.bf16.msra.mxu0 %v5416_v0  ;;  %v300_v0 = vmax.f32 %v268_v58, 0.0  ;;  %v5554_v58 = vld [vmem:[#allocation6 + $0x460] ss:$8 sps:$4 sm:$0xff]  }
  0xe9   : > { %1938 = vmatprep.subr.bf16.mxu0 %v5421_v1  ;;  %v316_v1 = vmax.f32 %v284_v59, 0.0  ;;  %v5559_v59 = vld [vmem:[#allocation6 + $0x474] ss:$8 sps:$4 sm:$0xff]  }
  0xec   : > { %1939 = vmatpush1.bf16.msra.mxu0 %v5419_v2  ;;  %v329_v2 = vpack.c.bf16 %v313_v62, %v297_v61  ;;  %v5562_v61 = vld [vmem:[#allocation6 + $0x484] ss:$8 sps:$4 sm:$0xff]   ;;  %v5560_v62 = vld [vmem:[#allocation6 + $0x480] ss:$8 sps:$4 sm:$0xff]  }
  0xed   : > { %1940 = vmatprep.subr.bf16.mxu0 %v5424_v3  ;;  %v5488_v3 = vld [vmem:[#allocation6 + $0x300] ss:$8 sps:$4 sm:$0xff]  }
  0xf0   : > { %1941 = vmatpush1.bf16.msra.mxu0 %v5422_v4  ;;  %v5493_v4 = vld [vmem:[#allocation6 + $0x314] ss:$8 sps:$4 sm:$0xff]  }
  0xf1   : > { %1942 = vmatprep.subr.bf16.mxu0 %v5427_v5  ;;  %v332_v5 = vpack.c.bf16 %v316_v1, %v300_v0  ;;  %v5563_v0 = vld [vmem:[#allocation6 + $0x490] ss:$8 sps:$4 sm:$0xff]   ;;  %v5568_v1 = vld [vmem:[#allocation6 + $0x4a4] ss:$8 sps:$4 sm:$0xff]  }
  0xf4   : > { %1943 = vmatpush1.bf16.msra.mxu0 %v5425_v6  ;;  %v5491_v6 = vld [vmem:[#allocation6 + $0x310] ss:$8 sps:$4 sm:$0xff]  }
  0xf5   : > { %1944 = vmatprep.subr.bf16.mxu0 %v5430_v7  ;;  %v5496_v7 = vld [vmem:[#allocation6 + $0x324] ss:$8 sps:$4 sm:$0xff]  }
  0xf8   : > { %1945 = vmatpush1.bf16.msra.mxu0 %v5428_v8  ;;  %v5494_v8 = vld [vmem:[#allocation6 + $0x320] ss:$8 sps:$4 sm:$0xff]  }
  0xf9   : > { %1946 = vmatprep.subr.bf16.mxu0 %v5433_v9  ;;  %v5499_v9 = vld [vmem:[#allocation6 + $0x334] ss:$8 sps:$4 sm:$0xff]  }
  0xfc   : > { %1947 = vmatpush1.bf16.msra.mxu0 %v5431_v10  ;;  %v5497_v10 = vld [vmem:[#allocation6 + $0x330] ss:$8 sps:$4 sm:$0xff]  }
  0xfd   : > { %1948 = vmatprep.subr.bf16.mxu0 %v5436_v11  ;;  %v5502_v11 = vld [vmem:[#allocation6 + $0x344] ss:$8 sps:$4 sm:$0xff]  }
 0x100   : > { %1949 = vmatpush1.bf16.msra.mxu0 %v5434_v12  ;;  %v5500_v12 = vld [vmem:[#allocation6 + $0x340] ss:$8 sps:$4 sm:$0xff]  }
 0x101   : > { %1950 = vmatprep.subr.bf16.mxu0 %v5439_v15  ;;  %v5508_v15 = vld [vmem:[#allocation6 + $0x364] ss:$8 sps:$4 sm:$0xff]  }
 0x104   : > { %1951 = vmatpush1.bf16.msra.mxu0 %v5437_v18  ;;  %v5509_v18 = vld [vmem:[#allocation6 + $0x370] ss:$8 sps:$4 sm:$0xff]  }
 0x105   : > { %1963 = vmatprep.subr.bf16.mxu0 %v5442_v21  ;;  %v5517_v21 = vld [vmem:[#allocation6 + $0x394] ss:$8 sps:$4 sm:$0xff]  }
 0x107   : > { %1953 = vmatmul.mubr.bf16.vlgmr.msra.gmra.mrb[0].mxu0 %v327_v24  ;;  %v5518_v24 = vld [vmem:[#allocation6 + $0x3a0] ss:$8 sps:$4 sm:$0xff]  }
 0x108   : > { %1964 = vmatpush1.bf16.msra.mxu0 %v5440_v25  ;;  %1995 = vmatprep.mubr.bf16.mxu0 %v330_v27  ;;  %v5523_v25 = vld [vmem:[#allocation6 + $0x3b4] ss:$8 sps:$4 sm:$0xff]   ;;  %v5526_v27 = vld [vmem:[#allocation6 + $0x3c4] ss:$8 sps:$4 sm:$0xff]  }
 0x109   : > { %1965 = vmatprep.subr.bf16.mxu0 %v5445_v26  ;;  %v5521_v26 = vld [vmem:[#allocation6 + $0x3b0] ss:$8 sps:$4 sm:$0xff]  }
 0x10c   : > { %1966 = vmatpush1.bf16.msra.mxu0 %v5443_v28  ;;  %v5524_v28 = vld [vmem:[#allocation6 + $0x3c0] ss:$8 sps:$4 sm:$0xff]  }
 0x10d   : > { %1967 = vmatprep.subr.bf16.mxu0 %v5448_v29  ;;  %v5529_v29 = vld [vmem:[#allocation6 + $0x3d4] ss:$8 sps:$4 sm:$0xff]  }
 0x110   : > { %1968 = vmatpush1.bf16.msra.mxu0 %v5446_v30  ;;  %v5527_v30 = vld [vmem:[#allocation6 + $0x3d0] ss:$8 sps:$4 sm:$0xff]  }
 0x111   : > { %1969 = vmatprep.subr.bf16.mxu0 %v5451_v31  ;;  %v5532_v31 = vld [vmem:[#allocation6 + $0x3e4] ss:$8 sps:$4 sm:$0xff]  }
 0x114   : > { %1970 = vmatpush1.bf16.msra.mxu0 %v5449_v32  ;;  %v5530_v32 = vld [vmem:[#allocation6 + $0x3e0] ss:$8 sps:$4 sm:$0xff]  }
 0x115   : > { %1971 = vmatprep.subr.bf16.mxu0 %v5454_v33  ;;  %v267_v33 = vld [vmem:[%s6600_s29 + $0x30] sm:$0xff] }
 0x118   : > { %1972 = vmatpush1.bf16.msra.mxu0 %v5452_v34  ;;  %v283_v34 = vld [vmem:[%s6600_s29 + $0xb0] sm:$0xff] }
 0x119   : > { %1973 = vmatprep.subr.bf16.mxu0 %v5457_v35  ;;  %v5535_v35 = vld [vmem:[#allocation6 + $0x3f4] ss:$8 sps:$4 sm:$0xff]  }
 0x11c   : > { %1974 = vmatpush1.bf16.msra.mxu0 %v5455_v36  ;;  %v270_v36 = vld [vmem:[%s6600_s29 + $0x48] sm:$0xff] }
 0x11d   : > { %1975 = vmatprep.subr.bf16.mxu0 %v5460_v37  ;;  %v286_v37 = vld [vmem:[%s6600_s29 + $0xc8] sm:$0xff] }
 0x120   : > { %1976 = vmatpush1.bf16.msra.mxu0 %v5458_v38  ;;  %v5533_v38 = vld [vmem:[#allocation6 + $0x3f0] ss:$8 sps:$4 sm:$0xff]  }
 0x121   : > { %1977 = vmatprep.subr.bf16.mxu0 %v5463_v39  ;;  %v299_v39 = vmax.f32 %v267_v33, 0.0  ;;  %v5601_v33 = vld [vmem:[#allocation6 + $0x554] ss:$8 sps:$4 sm:$0xff]  }
 0x124   : > { %1978 = vmatpush1.bf16.msra.mxu0 %v5461_v40  ;;  %v315_v40 = vmax.f32 %v283_v34, 0.0  ;;  %v5599_v34 = vld [vmem:[#allocation6 + $0x550] ss:$8 sps:$4 sm:$0xff]  }
 0x125   : > { %1979 = vmatprep.subr.bf16.mxu0 %v5466_v41  ;;  %v5538_v41 = vld [vmem:[#allocation6 + $0x404] ss:$8 sps:$4 sm:$0xff]  }
 0x128   : > { %1980 = vmatpush1.bf16.msra.mxu0 %v5464_v42  ;;  %v302_v42 = vmax.f32 %v270_v36, 0.0  ;;  %v5602_v36 = vld [vmem:[#allocation6 + $0x560] ss:$8 sps:$4 sm:$0xff]  }
 0x129   : > { %1981 = vmatprep.subr.bf16.mxu0 %v5469_v43  ;;  %v318_v43 = vmax.f32 %v286_v37, 0.0  ;;  %v5607_v37 = vld [vmem:[#allocation6 + $0x574] ss:$8 sps:$4 sm:$0xff]  }
 0x12c   : > { %1982 = vmatpush1.bf16.msra.mxu0 %v5467_v44  ;;  %v331_v44 = vpack.c.bf16 %v315_v40, %v299_v39  ;;  %v5610_v39 = vld [vmem:[#allocation6 + $0x584] ss:$8 sps:$4 sm:$0xff]   ;;  %v5608_v40 = vld [vmem:[#allocation6 + $0x580] ss:$8 sps:$4 sm:$0xff]  }
 0x12d   : > { %1983 = vmatprep.subr.bf16.mxu0 %v5472_v45  ;;  %v5536_v45 = vld [vmem:[#allocation6 + $0x400] ss:$8 sps:$4 sm:$0xff]  }
 0x130   : > { %1984 = vmatpush1.bf16.msra.mxu0 %v5470_v46  ;;  %v5541_v46 = vld [vmem:[#allocation6 + $0x414] ss:$8 sps:$4 sm:$0xff]  }
 0x131   : > { %1985 = vmatprep.subr.bf16.mxu0 %v5475_v47  ;;  %v334_v47 = vpack.c.bf16 %v318_v43, %v302_v42  ;;  %v5611_v42 = vld [vmem:[#allocation6 + $0x590] ss:$8 sps:$4 sm:$0xff]   ;;  %v5616_v43 = vld [vmem:[#allocation6 + $0x5a4] ss:$8 sps:$4 sm:$0xff]  }
 0x134   : > { %1986 = vmatpush1.bf16.msra.mxu0 %v5473_v48  ;;  %v5539_v48 = vld [vmem:[#allocation6 + $0x410] ss:$8 sps:$4 sm:$0xff]  }
 0x135   : > { %1987 = vmatprep.subr.bf16.mxu0 %v5478_v49  ;;  %v5544_v49 = vld [vmem:[#allocation6 + $0x424] ss:$8 sps:$4 sm:$0xff]  }
 0x138   : > { %1988 = vmatpush1.bf16.msra.mxu0 %v5476_v50  ;;  %v5542_v50 = vld [vmem:[#allocation6 + $0x420] ss:$8 sps:$4 sm:$0xff]  }
 0x139   : > { %1989 = vmatprep.subr.bf16.mxu0 %v5481_v51  ;;  %v5547_v51 = vld [vmem:[#allocation6 + $0x434] ss:$8 sps:$4 sm:$0xff]  }
 0x13c   : > { %1990 = vmatpush1.bf16.msra.mxu0 %v5479_v52  ;;  %v5545_v52 = vld [vmem:[#allocation6 + $0x430] ss:$8 sps:$4 sm:$0xff]  }
 0x13d   : > { %1991 = vmatprep.subr.bf16.mxu0 %v5484_v53  ;;  %v5550_v53 = vld [vmem:[#allocation6 + $0x444] ss:$8 sps:$4 sm:$0xff]  }
 0x140   : > { %1992 = vmatpush1.bf16.msra.mxu0 %v5482_v54  ;;  %v5548_v54 = vld [vmem:[#allocation6 + $0x440] ss:$8 sps:$4 sm:$0xff]  }
 0x141   : > { %1993 = vmatprep.subr.bf16.mxu0 %v5487_v57  ;;  %v5556_v57 = vld [vmem:[#allocation6 + $0x464] ss:$8 sps:$4 sm:$0xff]  }
 0x144   : > { %1994 = vmatpush1.bf16.msra.mxu0 %v5485_v60  ;;  %v5557_v60 = vld [vmem:[#allocation6 + $0x470] ss:$8 sps:$4 sm:$0xff]  }
 0x145   : > { %2006 = vmatprep.subr.bf16.mxu0 %v5490_v63  ;;  %v5565_v63 = vld [vmem:[#allocation6 + $0x494] ss:$8 sps:$4 sm:$0xff]  }
 0x147   : > { %1996 = vmatmul.mubr.bf16.vlgmr.msra.gmra.mrb[0].mxu0 %v329_v2  ;;  %v5566_v2 = vld [vmem:[#allocation6 + $0x4a0] ss:$8 sps:$4 sm:$0xff]  }
 0x148   : > { %2007 = vmatpush1.bf16.msra.mxu0 %v5488_v3  ;;  %2038 = vmatprep.mubr.bf16.mxu0 %v332_v5  ;;  %v5571_v3 = vld [vmem:[#allocation6 + $0x4b4] ss:$8 sps:$4 sm:$0xff]   ;;  %v5574_v5 = vld [vmem:[#allocation6 + $0x4c4] ss:$8 sps:$4 sm:$0xff]  }
 0x149   : > { %2008 = vmatprep.subr.bf16.mxu0 %v5493_v4  ;;  %v5569_v4 = vld [vmem:[#allocation6 + $0x4b0] ss:$8 sps:$4 sm:$0xff]  }
 0x14c   : > { %2009 = vmatpush1.bf16.msra.mxu0 %v5491_v6  ;;  %v5572_v6 = vld [vmem:[#allocation6 + $0x4c0] ss:$8 sps:$4 sm:$0xff]  }
 0x14d   : > { %2010 = vmatprep.subr.bf16.mxu0 %v5496_v7  ;;  %v5577_v7 = vld [vmem:[#allocation6 + $0x4d4] ss:$8 sps:$4 sm:$0xff]  }
 0x150   : > { %2011 = vmatpush1.bf16.msra.mxu0 %v5494_v8  ;;  %v5575_v8 = vld [vmem:[#allocation6 + $0x4d0] ss:$8 sps:$4 sm:$0xff]  }
 0x151   : > { %2012 = vmatprep.subr.bf16.mxu0 %v5499_v9  ;;  %v5580_v9 = vld [vmem:[#allocation6 + $0x4e4] ss:$8 sps:$4 sm:$0xff]  }
 0x154   : > { %2013 = vmatpush1.bf16.msra.mxu0 %v5497_v10  ;;  %v5578_v10 = vld [vmem:[#allocation6 + $0x4e0] ss:$8 sps:$4 sm:$0xff]  }
 0x155   : > { %2014 = vmatprep.subr.bf16.mxu0 %v5502_v11  ;;  %v269_v11 = vld [vmem:[%s6600_s29 + $0x40] sm:$0xff] }
 0x158   : > { %2015 = vmatpush1.bf16.msra.mxu0 %v5500_v12  ;;  %v285_v12 = vld [vmem:[%s6600_s29 + $0xc0] sm:$0xff] }
 0x159   : > { %2016 = vmatprep.subr.bf16.mxu0 %v5505_v13  ;;  %v5583_v13 = vld [vmem:[#allocation6 + $0x4f4] ss:$8 sps:$4 sm:$0xff]  }
 0x15c   : > { %2017 = vmatpush1.bf16.msra.mxu0 %v5503_v14  ;;  %v272_v14 = vld [vmem:[%s6600_s29 + $0x58] sm:$0xff] }
 0x15d   : > { %2018 = vmatprep.subr.bf16.mxu0 %v5508_v15  ;;  %v288_v15 = vld [vmem:[%s6600_s29 + $0xd8] sm:$0xff] }
 0x160   : > { %2019 = vmatpush1.bf16.msra.mxu0 %v5506_v16  ;;  %v301_v16 = vmax.f32 %v269_v11, 0.0  ;;  %v5740_v11 = vld [vmem:[#allocation8 + $0x124] ss:$72 sps:$4 sm:$0xff]  }
 0x161   : > { %2020 = vmatprep.subr.bf16.mxu0 %v5511_v17  ;;  %v317_v17 = vmax.f32 %v285_v12, 0.0  ;;  %v5643_v12 = vld [vmem:[#allocation6 + $0x634] ss:$8 sps:$4 sm:$0xff]  }
 0x164   : > { %2021 = vmatpush1.bf16.msra.mxu0 %v5509_v18  ;;  %v5581_v18 = vld [vmem:[#allocation6 + $0x4f0] ss:$8 sps:$4 sm:$0xff]  }
 0x165   : > { %2022 = vmatprep.subr.bf16.mxu0 %v5514_v19  ;;  %v304_v19 = vmax.f32 %v272_v14, 0.0  ;;  %v5641_v14 = vld [vmem:[#allocation6 + $0x630] ss:$8 sps:$4 sm:$0xff]  }
 0x168   : > { %2023 = vmatpush1.bf16.msra.mxu0 %v5512_v20  ;;  %v320_v20 = vmax.f32 %v288_v15, 0.0  ;;  %v5746_v15 = vld [vmem:[#allocation8 + $0x1b4] ss:$72 sps:$4 sm:$0xff]  }
 0x169   : > { %2024 = vmatprep.subr.bf16.mxu0 %v5517_v21  ;;  %v5586_v21 = vld [vmem:[#allocation6 + $0x504] ss:$8 sps:$4 sm:$0xff]  }
 0x16c   : > { %2025 = vmatpush1.bf16.msra.mxu0 %v5515_v22  ;;  %v333_v22 = vpack.c.bf16 %v317_v17, %v301_v16  ;;  %v5646_v16 = vld [vmem:[#allocation6 + $0x644] ss:$8 sps:$4 sm:$0xff]   ;;  %v5748_v17 = vld [vmem:[#allocation8 + $0x1b0] ss:$72 sps:$4 sm:$0xff]  }
 0x16d   : > { %2026 = vmatprep.subr.bf16.mxu0 %v5520_v23  ;;  %v5584_v23 = vld [vmem:[#allocation6 + $0x500] ss:$8 sps:$4 sm:$0xff]  }
 0x170   : > { %2027 = vmatpush1.bf16.msra.mxu0 %v5518_v24  ;;  %v336_v24 = vpack.c.bf16 %v320_v20, %v304_v19  ;;  %v5752_v19 = vld [vmem:[#allocation8 + $0x244] ss:$72 sps:$4 sm:$0xff]   ;;  %v5649_v20 = vld [vmem:[#allocation6 + $0x654] ss:$8 sps:$4 sm:$0xff]  }
 0x171   : > { %2028 = vmatprep.subr.bf16.mxu0 %v5523_v25  ;;  %v5589_v25 = vld [vmem:[#allocation6 + $0x514] ss:$8 sps:$4 sm:$0xff]  }
 0x174   : > { %2029 = vmatpush1.bf16.msra.mxu0 %v5521_v26  ;;  %v5587_v26 = vld [vmem:[#allocation6 + $0x510] ss:$8 sps:$4 sm:$0xff]  }
 0x175   : > { %2030 = vmatprep.subr.bf16.mxu0 %v5526_v27  ;;  %v5592_v27 = vld [vmem:[#allocation6 + $0x524] ss:$8 sps:$4 sm:$0xff]  }
 0x178   : > { %2031 = vmatpush1.bf16.msra.mxu0 %v5524_v28  ;;  %v5590_v28 = vld [vmem:[#allocation6 + $0x520] ss:$8 sps:$4 sm:$0xff]  }
 0x179   : > { %2032 = vmatprep.subr.bf16.mxu0 %v5529_v29  ;;  %v5595_v29 = vld [vmem:[#allocation6 + $0x534] ss:$8 sps:$4 sm:$0xff]  }
 0x17c   : > { %2033 = vmatpush1.bf16.msra.mxu0 %v5527_v30  ;;  %v5593_v30 = vld [vmem:[#allocation6 + $0x530] ss:$8 sps:$4 sm:$0xff]  }
 0x17d   : > { %2034 = vmatprep.subr.bf16.mxu0 %v5532_v31  ;;  %v5598_v31 = vld [vmem:[#allocation6 + $0x544] ss:$8 sps:$4 sm:$0xff]  }
 0x180   : > { %2035 = vmatpush1.bf16.msra.mxu0 %v5530_v32  ;;  %v5596_v32 = vld [vmem:[#allocation6 + $0x540] ss:$8 sps:$4 sm:$0xff]  }
 0x181   : > { %2036 = vmatprep.subr.bf16.mxu0 %v5535_v35  ;;  %v5604_v35 = vld [vmem:[#allocation6 + $0x564] ss:$8 sps:$4 sm:$0xff]  }
 0x184   : > { %2037 = vmatpush1.bf16.msra.mxu0 %v5533_v38  ;;  %v5605_v38 = vld [vmem:[#allocation6 + $0x570] ss:$8 sps:$4 sm:$0xff]  }
 0x185   : > { %2049 = vmatprep.subr.bf16.mxu0 %v5538_v41  ;;  %v5613_v41 = vld [vmem:[#allocation6 + $0x594] ss:$8 sps:$4 sm:$0xff]  }
 0x187   : > { %2039 = vmatmul.mubr.bf16.vlgmr.msra.gmra.mrb[0].mxu0 %v331_v44  ;;  %v5614_v44 = vld [vmem:[#allocation6 + $0x5a0] ss:$8 sps:$4 sm:$0xff]  }
 0x188   : > { %2050 = vmatpush1.bf16.msra.mxu0 %v5536_v45  ;;  %2081 = vmatprep.mubr.bf16.mxu0 %v334_v47  ;;  %v5619_v45 = vld [vmem:[#allocation6 + $0x5b4] ss:$8 sps:$4 sm:$0xff]   ;;  %v5622_v47 = vld [vmem:[#allocation6 + $0x5c4] ss:$8 sps:$4 sm:$0xff]  }
 0x189   : > { %2051 = vmatprep.subr.bf16.mxu0 %v5541_v46  ;;  %v5617_v46 = vld [vmem:[#allocation6 + $0x5b0] ss:$8 sps:$4 sm:$0xff]  }
 0x18c   : > { %2052 = vmatpush1.bf16.msra.mxu0 %v5539_v48  ;;  %v5620_v48 = vld [vmem:[#allocation6 + $0x5c0] ss:$8 sps:$4 sm:$0xff]  }
 0x18d   : > { %2053 = vmatprep.subr.bf16.mxu0 %v5544_v49  ;;  %v5625_v49 = vld [vmem:[#allocation6 + $0x5d4] ss:$8 sps:$4 sm:$0xff]  }
 0x190   : > { %2054 = vmatpush1.bf16.msra.mxu0 %v5542_v50  ;;  %v5623_v50 = vld [vmem:[#allocation6 + $0x5d0] ss:$8 sps:$4 sm:$0xff]  }
 0x191   : > { %2055 = vmatprep.subr.bf16.mxu0 %v5547_v51  ;;  %v5628_v51 = vld [vmem:[#allocation6 + $0x5e4] ss:$8 sps:$4 sm:$0xff]  }
 0x194   : > { %2056 = vmatpush1.bf16.msra.mxu0 %v5545_v52  ;;  %v5626_v52 = vld [vmem:[#allocation6 + $0x5e0] ss:$8 sps:$4 sm:$0xff]  }
 0x195   : > { %2057 = vmatprep.subr.bf16.mxu0 %v5550_v53  ;;  %v271_v53 = vld [vmem:[%s6600_s29 + $0x50] sm:$0xff] }
 0x198   : > { %2058 = vmatpush1.bf16.msra.mxu0 %v5548_v54  ;;  %v287_v54 = vld [vmem:[%s6600_s29 + $0xd0] sm:$0xff] }
 0x199   : > { %2059 = vmatprep.subr.bf16.mxu0 %v5553_v55  ;;  %v5631_v55 = vld [vmem:[#allocation6 + $0x5f4] ss:$8 sps:$4 sm:$0xff]  }
 0x19c   : > { %2060 = vmatpush1.bf16.msra.mxu0 %v5551_v56  ;;  %v274_v56 = vld [vmem:[%s6600_s29 + $0x68] sm:$0xff] }
 0x19d   : > { %2061 = vmatprep.subr.bf16.mxu0 %v5556_v57  ;;  %v290_v57 = vld [vmem:[%s6600_s29 + $0xe8] sm:$0xff] }
 0x1a0   : > { %2062 = vmatpush1.bf16.msra.mxu0 %v5554_v58  ;;  %v303_v58 = vmax.f32 %v271_v53, 0.0  ;;  %v5802_v53 = vld [vmem:[#allocation8 + $0x6c0] ss:$72 sps:$4 sm:$0xff]  }
 0x1a1   : > { %2063 = vmatprep.subr.bf16.mxu0 %v5559_v59  ;;  %v319_v59 = vmax.f32 %v287_v54, 0.0  ;;  %v5671_v54 = vld [vmem:[#allocation6 + $0x6d0] ss:$8 sps:$4 sm:$0xff]  }
 0x1a4   : > { %2064 = vmatpush1.bf16.msra.mxu0 %v5557_v60  ;;  %v5629_v60 = vld [vmem:[#allocation6 + $0x5f0] ss:$8 sps:$4 sm:$0xff]  }
 0x1a5   : > { %2065 = vmatprep.subr.bf16.mxu0 %v5562_v61  ;;  %v306_v61 = vmax.f32 %v274_v56, 0.0  ;;  %v5676_v56 = vld [vmem:[#allocation6 + $0x6e4] ss:$8 sps:$4 sm:$0xff]  }
 0x1a8   : > { %2066 = vmatpush1.bf16.msra.mxu0 %v5560_v62  ;;  %v322_v62 = vmax.f32 %v290_v57, 0.0  ;;  %v5808_v57 = vld [vmem:[#allocation8 + $0x750] ss:$72 sps:$4 sm:$0xff]  }
 0x1a9   : > { %2067 = vmatprep.subr.bf16.mxu0 %v5565_v63  ;;  %v5634_v63 = vld [vmem:[#allocation6 + $0x604] ss:$8 sps:$4 sm:$0xff]  }
 0x1ac   : > { %2068 = vmatpush1.bf16.msra.mxu0 %v5563_v0  ;;  %v335_v0 = vpack.c.bf16 %v319_v59, %v303_v58  ;;  %v5674_v58 = vld [vmem:[#allocation6 + $0x6e0] ss:$8 sps:$4 sm:$0xff]  }
 0x1ad   : > { %2069 = vmatprep.subr.bf16.mxu0 %v5568_v1  ;;  %v5632_v1 = vld [vmem:[#allocation6 + $0x600] ss:$8 sps:$4 sm:$0xff]  }
 0x1ae   : > { %v273_v59 = vld [vmem:[%s6600_s29 + $0x60] sm:$0xff] }
 0x1b0   : > { %2070 = vmatpush1.bf16.msra.mxu0 %v5566_v2  ;;  %v338_v2 = vpack.c.bf16 %v322_v62, %v306_v61  ;;  %v5812_v61 = vld [vmem:[#allocation8 + $0x7e4] ss:$72 sps:$4 sm:$0xff]   ;;  %v5679_v62 = vld [vmem:[#allocation6 + $0x6f4] ss:$8 sps:$4 sm:$0xff]  }
 0x1b1   : > { %2071 = vmatprep.subr.bf16.mxu0 %v5571_v3  ;;  %v5637_v3 = vld [vmem:[#allocation6 + $0x614] ss:$8 sps:$4 sm:$0xff]  }
 0x1b4   : > { %2072 = vmatpush1.bf16.msra.mxu0 %v5569_v4  ;;  %v5728_v4 = vld [vmem:[#allocation8 + $0x4] ss:$72 sps:$4 sm:$0xff]  }
 0x1b5   : > { %2073 = vmatprep.subr.bf16.mxu0 %v5574_v5  ;;  %v5730_v5 = vld [vmem:[#allocation8] ss:$72 sps:$4 sm:$0xff]   ;;  %3951 = vmatprep.subr.bf16.mxu1 %v5728_v4  ;;  %v5677_v4 = vld [vmem:[#allocation6 + $0x6f0] ss:$8 sps:$4 sm:$0xff]  }
 0x1b6   : > { %3952 = vmatpush1.bf16.msra.mxu1 %v5730_v5 }
 0x1b8   : > { %2074 = vmatpush1.bf16.msra.mxu0 %v5572_v6  ;;  %v5635_v6 = vld [vmem:[#allocation6 + $0x610] ss:$8 sps:$4 sm:$0xff]  }
 0x1b9   : > { %2075 = vmatprep.subr.bf16.mxu0 %v5577_v7  ;;  %v5734_v7 = vld [vmem:[#allocation8 + $0x94] ss:$72 sps:$4 sm:$0xff]  }
 0x1ba   : > { %3953 = vmatprep.subr.bf16.mxu1 %v5734_v7  ;;  %v5682_v7 = vld [vmem:[#allocation6 + $0x704] ss:$8 sps:$4 sm:$0xff]  }
 0x1bc   : > { %2076 = vmatpush1.bf16.msra.mxu0 %v5575_v8  ;;  %v5640_v8 = vld [vmem:[#allocation6 + $0x624] ss:$8 sps:$4 sm:$0xff]  }
 0x1bd   : > { %2077 = vmatprep.subr.bf16.mxu0 %v5580_v9  ;;  %v5736_v9 = vld [vmem:[#allocation8 + $0x90] ss:$72 sps:$4 sm:$0xff]  }
 0x1be   : > { %3954 = vmatpush1.bf16.msra.mxu1 %v5736_v9  ;;  %v5680_v9 = vld [vmem:[#allocation6 + $0x700] ss:$8 sps:$4 sm:$0xff]  }
 0x1bf   : > { %3955 = vmatprep.subr.bf16.mxu1 %v5740_v11  ;;  %v5685_v11 = vld [vmem:[#allocation6 + $0x714] ss:$8 sps:$4 sm:$0xff]  }
 0x1c0   : > { %2078 = vmatpush1.bf16.msra.mxu0 %v5578_v10  ;;  %v5638_v10 = vld [vmem:[#allocation6 + $0x620] ss:$8 sps:$4 sm:$0xff]  }
 0x1c1   : > { %2079 = vmatprep.subr.bf16.mxu0 %v5583_v13  ;;  %v5742_v13 = vld [vmem:[#allocation8 + $0x120] ss:$72 sps:$4 sm:$0xff]  }
 0x1c2   : > { %3956 = vmatpush1.bf16.msra.mxu1 %v5742_v13  ;;  %v5688_v13 = vld [vmem:[#allocation6 + $0x724] ss:$8 sps:$4 sm:$0xff]  }
 0x1c3   : > { %3957 = vmatprep.subr.bf16.mxu1 %v5746_v15  ;;  %v5691_v15 = vld [vmem:[#allocation6 + $0x734] ss:$8 sps:$4 sm:$0xff]  }
 0x1c4   : > { %2080 = vmatpush1.bf16.msra.mxu0 %v5581_v18  ;;  %v5644_v18 = vld [vmem:[#allocation6 + $0x640] ss:$8 sps:$4 sm:$0xff]  }
 0x1c5   : > { %2092 = vmatprep.subr.bf16.mxu0 %v5586_v21  ;;  %v5754_v21 = vld [vmem:[#allocation8 + $0x240] ss:$72 sps:$4 sm:$0xff]  }
 0x1c6   : > { %3958 = vmatpush1.bf16.msra.mxu1 %v5748_v17  ;;  %v5694_v17 = vld [vmem:[#allocation6 + $0x744] ss:$8 sps:$4 sm:$0xff]  }
 0x1c7   : > { %2082 = vmatmul.mubr.bf16.vlgmr.msra.gmra.mrb[0].mxu0 %v333_v22  ;;  %3959 = vmatprep.subr.bf16.mxu1 %v5752_v19  ;;  %v5647_v22 = vld [vmem:[#allocation6 + $0x650] ss:$8 sps:$4 sm:$0xff]   ;;  %v5697_v19 = vld [vmem:[#allocation6 + $0x754] ss:$8 sps:$4 sm:$0xff]  }
 0x1c8   : > { %2093 = vmatpush1.bf16.msra.mxu0 %v5584_v23  ;;  %2124 = vmatprep.mubr.bf16.mxu0 %v336_v24  ;;  %v5758_v23 = vld [vmem:[#allocation8 + $0x2d4] ss:$72 sps:$4 sm:$0xff]   ;;  %v5652_v24 = vld [vmem:[#allocation6 + $0x664] ss:$8 sps:$4 sm:$0xff]  }
 0x1c9   : > { %2094 = vmatprep.subr.bf16.mxu0 %v5589_v25  ;;  %v5760_v25 = vld [vmem:[#allocation8 + $0x2d0] ss:$72 sps:$4 sm:$0xff]  }
 0x1ca   : > { %3960 = vmatpush1.bf16.msra.mxu1 %v5754_v21  ;;  %v5700_v21 = vld [vmem:[#allocation6 + $0x764] ss:$8 sps:$4 sm:$0xff]  }
 0x1cb   : > { %3961 = vmatprep.subr.bf16.mxu1 %v5758_v23  ;;  %v5703_v23 = vld [vmem:[#allocation6 + $0x774] ss:$8 sps:$4 sm:$0xff]  }
 0x1cc   : > { %2095 = vmatpush1.bf16.msra.mxu0 %v5587_v26  ;;  %v5650_v26 = vld [vmem:[#allocation6 + $0x660] ss:$8 sps:$4 sm:$0xff]  }
 0x1cd   : > { %2096 = vmatprep.subr.bf16.mxu0 %v5592_v27  ;;  %v5764_v27 = vld [vmem:[#allocation8 + $0x364] ss:$72 sps:$4 sm:$0xff]  }
 0x1ce   : > { %3962 = vmatpush1.bf16.msra.mxu1 %v5760_v25  ;;  %v5706_v25 = vld [vmem:[#allocation6 + $0x784] ss:$8 sps:$4 sm:$0xff]  }
 0x1cf   : > { %3963 = vmatprep.subr.bf16.mxu1 %v5764_v27  ;;  %v5709_v27 = vld [vmem:[#allocation6 + $0x794] ss:$8 sps:$4 sm:$0xff]  }
 0x1d0   : > { %2097 = vmatpush1.bf16.msra.mxu0 %v5590_v28  ;;  %v5655_v28 = vld [vmem:[#allocation6 + $0x674] ss:$8 sps:$4 sm:$0xff]  }
 0x1d1   : > { %2098 = vmatprep.subr.bf16.mxu0 %v5595_v29  ;;  %v5766_v29 = vld [vmem:[#allocation8 + $0x360] ss:$72 sps:$4 sm:$0xff]  }
 0x1d2   : > { %3964 = vmatpush1.bf16.msra.mxu1 %v5766_v29  ;;  %v5712_v29 = vld [vmem:[#allocation6 + $0x7a4] ss:$8 sps:$4 sm:$0xff]  }
 0x1d4   : > { %2099 = vmatpush1.bf16.msra.mxu0 %v5593_v30  ;;  %v5653_v30 = vld [vmem:[#allocation6 + $0x670] ss:$8 sps:$4 sm:$0xff]  }
 0x1d5   : > { %2100 = vmatprep.subr.bf16.mxu0 %v5598_v31  ;;  %v5770_v31 = vld [vmem:[#allocation8 + $0x3f4] ss:$72 sps:$4 sm:$0xff]  }
 0x1d6   : > { %3965 = vmatprep.subr.bf16.mxu1 %v5770_v31  ;;  %v5715_v31 = vld [vmem:[#allocation6 + $0x7b4] ss:$8 sps:$4 sm:$0xff]  }
 0x1d8   : > { %2101 = vmatpush1.bf16.msra.mxu0 %v5596_v32  ;;  %v5658_v32 = vld [vmem:[#allocation6 + $0x684] ss:$8 sps:$4 sm:$0xff]  }
 0x1d9   : > { %2102 = vmatprep.subr.bf16.mxu0 %v5601_v33  ;;  %v5772_v33 = vld [vmem:[#allocation8 + $0x3f0] ss:$72 sps:$4 sm:$0xff]  }
 0x1da   : > { %3966 = vmatpush1.bf16.msra.mxu1 %v5772_v33  ;;  %v5718_v33 = vld [vmem:[#allocation6 + $0x7c4] ss:$8 sps:$4 sm:$0xff]  }
 0x1dc   : > { %2103 = vmatpush1.bf16.msra.mxu0 %v5599_v34  ;;  %v5656_v34 = vld [vmem:[#allocation6 + $0x680] ss:$8 sps:$4 sm:$0xff]  }
 0x1dd   : > { %2104 = vmatprep.subr.bf16.mxu0 %v5604_v35  ;;  %v5776_v35 = vld [vmem:[#allocation8 + $0x484] ss:$72 sps:$4 sm:$0xff]  }
 0x1de   : > { %3967 = vmatprep.subr.bf16.mxu1 %v5776_v35  ;;  %v5721_v35 = vld [vmem:[#allocation6 + $0x7d4] ss:$8 sps:$4 sm:$0xff]  }
 0x1e0   : > { %2105 = vmatpush1.bf16.msra.mxu0 %v5602_v36  ;;  %v5661_v36 = vld [vmem:[#allocation6 + $0x694] ss:$8 sps:$4 sm:$0xff]  }
 0x1e1   : > { %2106 = vmatprep.subr.bf16.mxu0 %v5607_v37  ;;  %v5778_v37 = vld [vmem:[#allocation8 + $0x480] ss:$72 sps:$4 sm:$0xff]  }
 0x1e2   : > { %3968 = vmatpush1.bf16.msra.mxu1 %v5778_v37  ;;  %v5724_v37 = vld [vmem:[#allocation6 + $0x7e4] ss:$8 sps:$4 sm:$0xff]  }
 0x1e4   : > { %2107 = vmatpush1.bf16.msra.mxu0 %v5605_v38  ;;  %v5659_v38 = vld [vmem:[#allocation6 + $0x690] ss:$8 sps:$4 sm:$0xff]  }
 0x1e5   : > { %2108 = vmatprep.subr.bf16.mxu0 %v5610_v39  ;;  %v5782_v39 = vld [vmem:[#allocation8 + $0x514] ss:$72 sps:$4 sm:$0xff]  }
 0x1e6   : > { %3969 = vmatprep.subr.bf16.mxu1 %v5782_v39  ;;  %v275_v39 = vld [vmem:[%s6600_s29 + $0x70] sm:$0xff] }
 0x1e8   : > { %2109 = vmatpush1.bf16.msra.mxu0 %v5608_v40  ;;  %v5664_v40 = vld [vmem:[#allocation6 + $0x6a4] ss:$8 sps:$4 sm:$0xff]  }
 0x1e9   : > { %2110 = vmatprep.subr.bf16.mxu0 %v5613_v41  ;;  %v5784_v41 = vld [vmem:[#allocation8 + $0x510] ss:$72 sps:$4 sm:$0xff]  }
 0x1ea   : > { %3970 = vmatpush1.bf16.msra.mxu1 %v5784_v41  ;;  %v5727_v41 = vld [vmem:[#allocation6 + $0x7f4] ss:$8 sps:$4 sm:$0xff]  }
 0x1ec   : > { %2111 = vmatpush1.bf16.msra.mxu0 %v5611_v42  ;;  %v5662_v42 = vld [vmem:[#allocation6 + $0x6a0] ss:$8 sps:$4 sm:$0xff]  }
 0x1ed   : > { %2112 = vmatprep.subr.bf16.mxu0 %v5616_v43  ;;  %v5788_v43 = vld [vmem:[#allocation8 + $0x5a4] ss:$72 sps:$4 sm:$0xff]  }
 0x1ee   : > { %3971 = vmatprep.subr.bf16.mxu1 %v5788_v43 }
 0x1f0   : > { %2113 = vmatpush1.bf16.msra.mxu0 %v5614_v44  ;;  %v5667_v44 = vld [vmem:[#allocation6 + $0x6b4] ss:$8 sps:$4 sm:$0xff]  }
 0x1f1   : > { %2114 = vmatprep.subr.bf16.mxu0 %v5619_v45  ;;  %v5790_v45 = vld [vmem:[#allocation8 + $0x5a0] ss:$72 sps:$4 sm:$0xff]  }
 0x1f2   : > { %3972 = vmatpush1.bf16.msra.mxu1 %v5790_v45  ;;  %v5733_v45 = vld [vmem:[#allocation8 + $0x44] ss:$72 sps:$4 sm:$0xff]  }
 0x1f4   : > { %2115 = vmatpush1.bf16.msra.mxu0 %v5617_v46  ;;  %v5665_v46 = vld [vmem:[#allocation6 + $0x6b0] ss:$8 sps:$4 sm:$0xff]  }
 0x1f5   : > { %2116 = vmatprep.subr.bf16.mxu0 %v5622_v47  ;;  %v5794_v47 = vld [vmem:[#allocation8 + $0x634] ss:$72 sps:$4 sm:$0xff]  }
 0x1f6   : > { %3973 = vmatprep.subr.bf16.mxu1 %v5794_v47  ;;  %v5731_v47 = vld [vmem:[#allocation8 + $0x40] ss:$72 sps:$4 sm:$0xff]  }
 0x1f8   : > { %2117 = vmatpush1.bf16.msra.mxu0 %v5620_v48  ;;  %v5670_v48 = vld [vmem:[#allocation6 + $0x6c4] ss:$8 sps:$4 sm:$0xff]  }
 0x1f9   : > { %2118 = vmatprep.subr.bf16.mxu0 %v5625_v49  ;;  %v5796_v49 = vld [vmem:[#allocation8 + $0x630] ss:$72 sps:$4 sm:$0xff]  }
 0x1fa   : > { %3974 = vmatpush1.bf16.msra.mxu1 %v5796_v49  ;;  %v5737_v49 = vld [vmem:[#allocation8 + $0xd0] ss:$72 sps:$4 sm:$0xff]  }
 0x1fc   : > { %2119 = vmatpush1.bf16.msra.mxu0 %v5623_v50  ;;  %v5668_v50 = vld [vmem:[#allocation6 + $0x6c0] ss:$8 sps:$4 sm:$0xff]  }
 0x1fd   : > { %2120 = vmatprep.subr.bf16.mxu0 %v5628_v51  ;;  %v5800_v51 = vld [vmem:[#allocation8 + $0x6c4] ss:$72 sps:$4 sm:$0xff]  }
 0x1fe   : > { %3975 = vmatprep.subr.bf16.mxu1 %v5800_v51  ;;  %v5743_v51 = vld [vmem:[#allocation8 + $0x160] ss:$72 sps:$4 sm:$0xff]  }
 0x1ff   : > { %3976 = vmatpush1.bf16.msra.mxu1 %v5802_v53  ;;  %v5749_v53 = vld [vmem:[#allocation8 + $0x1f0] ss:$72 sps:$4 sm:$0xff]  }
 0x200   : > { %2121 = vmatpush1.bf16.msra.mxu0 %v5626_v52  ;;  %v5673_v52 = vld [vmem:[#allocation6 + $0x6d4] ss:$8 sps:$4 sm:$0xff]  }
 0x201   : > { %2122 = vmatprep.subr.bf16.mxu0 %v5631_v55  ;;  %v5806_v55 = vld [vmem:[#allocation8 + $0x754] ss:$72 sps:$4 sm:$0xff]  }
 0x202   : > { %3977 = vmatprep.subr.bf16.mxu1 %v5806_v55  ;;  %v5755_v55 = vld [vmem:[#allocation8 + $0x280] ss:$72 sps:$4 sm:$0xff]  }
 0x203   : > { %3978 = vmatpush1.bf16.msra.mxu1 %v5808_v57  ;;  %v5761_v57 = vld [vmem:[#allocation8 + $0x310] ss:$72 sps:$4 sm:$0xff]  }
 0x204   : > { %2123 = vmatpush1.bf16.msra.mxu0 %v5629_v60  ;;  %v289_v60 = vld [vmem:[%s6600_s29 + $0xe0] sm:$0xff]  ;;  %3979 = vmatprep.subr.bf16.mxu1 %v5812_v61  ;;  %v5773_v61 = vld [vmem:[#allocation8 + $0x430] ss:$72 sps:$4 sm:$0xff]  }
 0x205   : > { %2135 = vmatprep.subr.bf16.mxu0 %v5634_v63  ;;  %v276_v63 = vld [vmem:[%s6600_s29 + $0x78] sm:$0xff] }
 0x206   : > { %v308_v5 = vmax.f32 %v276_v63, 0.0  ;;  %v5779_v63 = vld [vmem:[#allocation8 + $0x4c0] ss:$72 sps:$4 sm:$0xff]  }
 0x207   : > { %2125 = vmatmul.mubr.bf16.vlgmr.msra.gmra.mrb[0].mxu0 %v335_v0  ;;  %v292_v0 = vld [vmem:[%s6600_s29 + $0xf8] sm:$0xff] }
 0x208   : > { %2136 = vmatpush1.bf16.msra.mxu0 %v5632_v1  ;;  %2167 = vmatprep.mubr.bf16.mxu0 %v338_v2  ;;  %v5814_v1 = vld [vmem:[#allocation8 + $0x7e0] ss:$72 sps:$4 sm:$0xff]   ;;  %v305_v2 = vmax.f32 %v273_v59, 0.0 }
 0x209   : > { %2137 = vmatprep.subr.bf16.mxu0 %v5637_v3  ;;  %v321_v3 = vmax.f32 %v289_v60, 0.0  ;;  %3980 = vmatpush1.bf16.msra.mxu1 %v5814_v1  ;;  %v5767_v59 = vld [vmem:[#allocation8 + $0x3a0] ss:$72 sps:$4 sm:$0xff]   ;;  %v5775_v60 = vld [vmem:[#allocation8 + $0x434] ss:$72 sps:$4 sm:$0xff]  }
 0x20a   : > { %v5785_v1 = vld [vmem:[#allocation8 + $0x550] ss:$72 sps:$4 sm:$0xff]  }
 0x20c   : > { %2138 = vmatpush1.bf16.msra.mxu0 %v5635_v6  ;;  %v324_v6 = vmax.f32 %v292_v0, 0.0  ;;  %v5787_v0 = vld [vmem:[#allocation8 + $0x554] ss:$72 sps:$4 sm:$0xff]  }
 0x20d   : > { %2139 = vmatprep.subr.bf16.mxu0 %v5640_v8  ;;  %v337_v8 = vpack.c.bf16 %v321_v3, %v305_v2  ;;  %v5793_v2 = vld [vmem:[#allocation8 + $0x5e4] ss:$72 sps:$4 sm:$0xff]   ;;  %v5791_v3 = vld [vmem:[#allocation8 + $0x5e0] ss:$72 sps:$4 sm:$0xff]  }
 0x210   : > { %2140 = vmatpush1.bf16.msra.mxu0 %v5638_v10  ;;  %v340_v10 = vpack.c.bf16 %v324_v6, %v308_v5  ;;  %v5797_v5 = vld [vmem:[#allocation8 + $0x670] ss:$72 sps:$4 sm:$0xff]   ;;  %v5805_v6 = vld [vmem:[#allocation8 + $0x704] ss:$72 sps:$4 sm:$0xff]  }
 0x211   : > { %2141 = vmatprep.subr.bf16.mxu0 %v5643_v12  ;;  %v5683_v12 = vld [vmem:[#allocation6 + $0x710] ss:$8 sps:$4 sm:$0xff]  }
 0x214   : > { %2142 = vmatpush1.bf16.msra.mxu0 %v5641_v14  ;;  %v5686_v14 = vld [vmem:[#allocation6 + $0x720] ss:$8 sps:$4 sm:$0xff]  }
 0x215   : > { %2143 = vmatprep.subr.bf16.mxu0 %v5646_v16  ;;  %v5689_v16 = vld [vmem:[#allocation6 + $0x730] ss:$8 sps:$4 sm:$0xff]  }
 0x218   : > { %2144 = vmatpush1.bf16.msra.mxu0 %v5644_v18  ;;  %v5692_v18 = vld [vmem:[#allocation6 + $0x740] ss:$8 sps:$4 sm:$0xff]  }
 0x219   : > { %2145 = vmatprep.subr.bf16.mxu0 %v5649_v20  ;;  %v5695_v20 = vld [vmem:[#allocation6 + $0x750] ss:$8 sps:$4 sm:$0xff]  }
 0x21c   : > { %2146 = vmatpush1.bf16.msra.mxu0 %v5647_v22  ;;  %v5698_v22 = vld [vmem:[#allocation6 + $0x760] ss:$8 sps:$4 sm:$0xff]  }
 0x21d   : > { %2147 = vmatprep.subr.bf16.mxu0 %v5652_v24  ;;  %v5701_v24 = vld [vmem:[#allocation6 + $0x770] ss:$8 sps:$4 sm:$0xff]  }
 0x220   : > { %2148 = vmatpush1.bf16.msra.mxu0 %v5650_v26  ;;  %v5704_v26 = vld [vmem:[#allocation6 + $0x780] ss:$8 sps:$4 sm:$0xff]  }
 0x221   : > { %2149 = vmatprep.subr.bf16.mxu0 %v5655_v28  ;;  %v5707_v28 = vld [vmem:[#allocation6 + $0x790] ss:$8 sps:$4 sm:$0xff]  }
 0x224   : > { %2150 = vmatpush1.bf16.msra.mxu0 %v5653_v30  ;;  %v5710_v30 = vld [vmem:[#allocation6 + $0x7a0] ss:$8 sps:$4 sm:$0xff]  }
 0x225   : > { %2151 = vmatprep.subr.bf16.mxu0 %v5658_v32  ;;  %v5713_v32 = vld [vmem:[#allocation6 + $0x7b0] ss:$8 sps:$4 sm:$0xff]  }
 0x228   : > { %2152 = vmatpush1.bf16.msra.mxu0 %v5656_v34  ;;  %v5716_v34 = vld [vmem:[#allocation6 + $0x7c0] ss:$8 sps:$4 sm:$0xff]  }
 0x229   : > { %2153 = vmatprep.subr.bf16.mxu0 %v5661_v36  ;;  %v5719_v36 = vld [vmem:[#allocation6 + $0x7d0] ss:$8 sps:$4 sm:$0xff]  }
 0x22c   : > { %2154 = vmatpush1.bf16.msra.mxu0 %v5659_v38  ;;  %v5722_v38 = vld [vmem:[#allocation6 + $0x7e0] ss:$8 sps:$4 sm:$0xff]  }
 0x22d   : > { %2155 = vmatprep.subr.bf16.mxu0 %v5664_v40  ;;  %v291_v40 = vld [vmem:[%s6600_s29 + $0xf0] sm:$0xff] }
 0x22e   : > { %v323_v43 = vmax.f32 %v291_v40, 0.0  ;;  %v5853_v40 = vld [vmem:[#allocation8 + $0x51c] ss:$72 sps:$4 sm:$0xff]  }
 0x230   : > { %2156 = vmatpush1.bf16.msra.mxu0 %v5662_v42  ;;  %v307_v42 = vmax.f32 %v275_v39, 0.0  ;;  %v5848_v39 = vld [vmem:[#allocation8 + $0x488] ss:$72 sps:$4 sm:$0xff]  }
 0x231   : > { %2157 = vmatprep.subr.bf16.mxu0 %v5667_v44  ;;  %v5725_v44 = vld [vmem:[#allocation6 + $0x7f0] ss:$8 sps:$4 sm:$0xff]  }
 0x234   : > { %2158 = vmatpush1.bf16.msra.mxu0 %v5665_v46  ;;  %v339_v46 = vpack.c.bf16 %v323_v43, %v307_v42  ;;  %v5856_v42 = vld [vmem:[#allocation8 + $0x5ac] ss:$72 sps:$4 sm:$0xff]   ;;  %v5854_v43 = vld [vmem:[#allocation8 + $0x5a8] ss:$72 sps:$4 sm:$0xff]  }
 0x235   : > { %2159 = vmatprep.subr.bf16.mxu0 %v5670_v48  ;;  %v5739_v48 = vld [vmem:[#allocation8 + $0xd4] ss:$72 sps:$4 sm:$0xff]  }
 0x238   : > { %2160 = vmatpush1.bf16.msra.mxu0 %v5668_v50  ;;  %v5745_v50 = vld [vmem:[#allocation8 + $0x164] ss:$72 sps:$4 sm:$0xff]  }
 0x239   : > { %2161 = vmatprep.subr.bf16.mxu0 %v5673_v52  ;;  %v5751_v52 = vld [vmem:[#allocation8 + $0x1f4] ss:$72 sps:$4 sm:$0xff]  }
 0x23c   : > { %2162 = vmatpush1.bf16.msra.mxu0 %v5671_v54  ;;  %v5757_v54 = vld [vmem:[#allocation8 + $0x284] ss:$72 sps:$4 sm:$0xff]  }
 0x23d   : > { %2163 = vmatprep.subr.bf16.mxu0 %v5676_v56  ;;  %v5763_v56 = vld [vmem:[#allocation8 + $0x314] ss:$72 sps:$4 sm:$0xff]  }
 0x240   : > { %2164 = vmatpush1.bf16.msra.mxu0 %v5674_v58  ;;  %v5769_v58 = vld [vmem:[#allocation8 + $0x3a4] ss:$72 sps:$4 sm:$0xff]  }
 0x241   : > { %2165 = vmatprep.subr.bf16.mxu0 %v5679_v62  ;;  %v5781_v62 = vld [vmem:[#allocation8 + $0x4c4] ss:$72 sps:$4 sm:$0xff]  }
 0x244   : > { %2166 = vmatpush1.bf16.msra.mxu0 %v5677_v4  ;;  %v5799_v4 = vld [vmem:[#allocation8 + $0x674] ss:$72 sps:$4 sm:$0xff]  }
 0x245   : > { %2178 = vmatprep.subr.bf16.mxu0 %v5682_v7  ;;  %v5803_v7 = vld [vmem:[#allocation8 + $0x700] ss:$72 sps:$4 sm:$0xff]  }
 0x247   : > { %2168 = vmatmul.mubr.bf16.vlgmr.msra.gmra.mrb[0].mxu0 %v337_v8  ;;  %v5811_v8 = vld [vmem:[#allocation8 + $0x794] ss:$72 sps:$4 sm:$0xff]  }
 0x248   : > { %2179 = vmatpush1.bf16.msra.mxu0 %v5680_v9  ;;  %2210 = vmatprep.mubr.bf16.mxu0 %v340_v10  ;;  %v5809_v9 = vld [vmem:[#allocation8 + $0x790] ss:$72 sps:$4 sm:$0xff]   ;;  %v5817_v10 = vld [vmem:[#allocation8 + $0x824] ss:$72 sps:$4 sm:$0xff]  }
 0x249   : > { %2180 = vmatprep.subr.bf16.mxu0 %v5685_v11  ;;  %v5815_v11 = vld [vmem:[#allocation8 + $0x820] ss:$72 sps:$4 sm:$0xff]  }
 0x24c   : > { %2181 = vmatpush1.bf16.msra.mxu0 %v5683_v12  ;;  %v5818_v12 = vld [vmem:[#allocation8 + $0x874] ss:$72 sps:$4 sm:$0xff]  }
 0x24d   : > { %2182 = vmatprep.subr.bf16.mxu0 %v5688_v13  ;;  %v5820_v13 = vld [vmem:[#allocation8 + $0x870] ss:$72 sps:$4 sm:$0xff]   ;;  %3981 = vmatprep.subr.bf16.mxu1 %v5818_v12  ;;  %v5907_v12 = vld [vmem:[#allocation8 + $0x644] ss:$72 sps:$4 sm:$0xff]  }
 0x24e   : > { %3982 = vmatpush1.bf16.msra.mxu1 %v5820_v13  ;;  %v5905_v13 = vld [vmem:[#allocation8 + $0x640] ss:$72 sps:$4 sm:$0xff]  }
 0x250   : > { %2183 = vmatpush1.bf16.msra.mxu0 %v5686_v14  ;;  %v5823_v14 = vld [vmem:[#allocation8 + $0x8b4] ss:$72 sps:$4 sm:$0xff]  }
 0x251   : > { %2184 = vmatprep.subr.bf16.mxu0 %v5691_v15  ;;  %v5821_v15 = vld [vmem:[#allocation8 + $0x8b0] ss:$72 sps:$4 sm:$0xff]  }
 0x254   : > { %2185 = vmatpush1.bf16.msra.mxu0 %v5689_v16  ;;  %v5826_v16 = vld [vmem:[#allocation8 + $0xc] ss:$72 sps:$4 sm:$0xff]  }
 0x255   : > { %2186 = vmatprep.subr.bf16.mxu0 %v5694_v17  ;;  %3994 = vmatprep.subr.bf16.mxu1 %v5826_v16  ;;  %v5913_v16 = vld [vmem:[#allocation8 + $0x764] ss:$72 sps:$4 sm:$0xff]  }
 0x258   : > { %2187 = vmatpush1.bf16.msra.mxu0 %v5692_v18 }
 0x259   : > { %2188 = vmatprep.subr.bf16.mxu0 %v5697_v19 }
 0x25c   : > { %2189 = vmatpush1.bf16.msra.mxu0 %v5695_v20 }
 0x25d   : > { %2190 = vmatprep.subr.bf16.mxu0 %v5700_v21 }
 0x260   : > { %2191 = vmatpush1.bf16.msra.mxu0 %v5698_v22 }
 0x261   : > { %2192 = vmatprep.subr.bf16.mxu0 %v5703_v23  ;;  %v5824_v23 = vld [vmem:[#allocation8 + $0x8] ss:$72 sps:$4 sm:$0xff]  }
 0x264   : > { %2193 = vmatpush1.bf16.msra.mxu0 %v5701_v24  ;;  %v5829_v24 = vld [vmem:[#allocation8 + $0x9c] ss:$72 sps:$4 sm:$0xff]  }
 0x265   : > { %2194 = vmatprep.subr.bf16.mxu0 %v5706_v25  ;;  %v5827_v25 = vld [vmem:[#allocation8 + $0x98] ss:$72 sps:$4 sm:$0xff]  }
 0x268   : > { %2195 = vmatpush1.bf16.msra.mxu0 %v5704_v26  ;;  %v5832_v26 = vld [vmem:[#allocation8 + $0x12c] ss:$72 sps:$4 sm:$0xff]  }
 0x269   : > { %2196 = vmatprep.subr.bf16.mxu0 %v5709_v27  ;;  %v5830_v27 = vld [vmem:[#allocation8 + $0x128] ss:$72 sps:$4 sm:$0xff]  }
 0x26c   : > { %2197 = vmatpush1.bf16.msra.mxu0 %v5707_v28  ;;  %v5835_v28 = vld [vmem:[#allocation8 + $0x1bc] ss:$72 sps:$4 sm:$0xff]  }
 0x26d   : > { %2198 = vmatprep.subr.bf16.mxu0 %v5712_v29  ;;  %v5833_v29 = vld [vmem:[#allocation8 + $0x1b8] ss:$72 sps:$4 sm:$0xff]  }
 0x270   : > { %2199 = vmatpush1.bf16.msra.mxu0 %v5710_v30  ;;  %v5838_v30 = vld [vmem:[#allocation8 + $0x24c] ss:$72 sps:$4 sm:$0xff]  }
 0x271   : > { %2200 = vmatprep.subr.bf16.mxu0 %v5715_v31  ;;  %v5836_v31 = vld [vmem:[#allocation8 + $0x248] ss:$72 sps:$4 sm:$0xff]  }
 0x274   : > { %2201 = vmatpush1.bf16.msra.mxu0 %v5713_v32  ;;  %v5841_v32 = vld [vmem:[#allocation8 + $0x2dc] ss:$72 sps:$4 sm:$0xff]  }
 0x275   : > { %2202 = vmatprep.subr.bf16.mxu0 %v5718_v33  ;;  %v5839_v33 = vld [vmem:[#allocation8 + $0x2d8] ss:$72 sps:$4 sm:$0xff]  }
 0x278   : > { %2203 = vmatpush1.bf16.msra.mxu0 %v5716_v34  ;;  %v5844_v34 = vld [vmem:[#allocation8 + $0x36c] ss:$72 sps:$4 sm:$0xff]  }
 0x279   : > { %2204 = vmatprep.subr.bf16.mxu0 %v5721_v35  ;;  %v5842_v35 = vld [vmem:[#allocation8 + $0x368] ss:$72 sps:$4 sm:$0xff]  }
 0x27c   : > { %2205 = vmatpush1.bf16.msra.mxu0 %v5719_v36  ;;  %v5847_v36 = vld [vmem:[#allocation8 + $0x3fc] ss:$72 sps:$4 sm:$0xff]  }
 0x27d   : > { %2206 = vmatprep.subr.bf16.mxu0 %v5724_v37  ;;  %v5845_v37 = vld [vmem:[#allocation8 + $0x3f8] ss:$72 sps:$4 sm:$0xff]  }
 0x280   : > { %2207 = vmatpush1.bf16.msra.mxu0 %v5722_v38  ;;  %v5850_v38 = vld [vmem:[#allocation8 + $0x48c] ss:$72 sps:$4 sm:$0xff]  }
 0x281   : > { %2208 = vmatprep.subr.bf16.mxu0 %v5727_v41  ;;  %v5851_v41 = vld [vmem:[#allocation8 + $0x518] ss:$72 sps:$4 sm:$0xff]  }
 0x284   : > { %2209 = vmatpush1.bf16.msra.mxu0 %v5725_v44  ;;  %v5859_v44 = vld [vmem:[#allocation8 + $0x63c] ss:$72 sps:$4 sm:$0xff]  }
 0x285   : > { %4295 = vmatprep.subr.bf16.mxu0 %v5733_v45  ;;  %v5857_v45 = vld [vmem:[#allocation8 + $0x638] ss:$72 sps:$4 sm:$0xff]  }
 0x287   : > { %2211 = vmatmul.mubr.bf16.vlgmr.msra.gmra.mrb[0].mxu0 %v339_v46  ;;  %v5862_v46 = vld [vmem:[#allocation8 + $0x6cc] ss:$72 sps:$4 sm:$0xff]  }
 0x288   : > { %4296 = vmatpush1.bf16.msra.mxu0 %v5731_v47  ;;  %v5860_v47 = vld [vmem:[#allocation8 + $0x6c8] ss:$72 sps:$4 sm:$0xff]  }
 0x289   : > { %4297 = vmatprep.subr.bf16.mxu0 %v5739_v48  ;;  %v5865_v48 = vld [vmem:[#allocation8 + $0x75c] ss:$72 sps:$4 sm:$0xff]  }
 0x28c   : > { %4298 = vmatpush1.bf16.msra.mxu0 %v5737_v49  ;;  %v5863_v49 = vld [vmem:[#allocation8 + $0x758] ss:$72 sps:$4 sm:$0xff]  }
 0x28d   : > { %4299 = vmatprep.subr.bf16.mxu0 %v5745_v50  ;;  %v5868_v50 = vld [vmem:[#allocation8 + $0x7ec] ss:$72 sps:$4 sm:$0xff]  }
 0x290   : > { %4300 = vmatpush1.bf16.msra.mxu0 %v5743_v51  ;;  %v5866_v51 = vld [vmem:[#allocation8 + $0x7e8] ss:$72 sps:$4 sm:$0xff]  }
 0x291   : > { %4301 = vmatprep.subr.bf16.mxu0 %v5751_v52  ;;  %v5871_v52 = vld [vmem:[#allocation8 + $0x87c] ss:$72 sps:$4 sm:$0xff]  }
 0x294   : > { %4302 = vmatpush1.bf16.msra.mxu0 %v5749_v53  ;;  %v5869_v53 = vld [vmem:[#allocation8 + $0x878] ss:$72 sps:$4 sm:$0xff]  }
 0x295   : > { %4303 = vmatprep.subr.bf16.mxu0 %v5757_v54  ;;  %v5874_v54 = vld [vmem:[#allocation8 + $0x14] ss:$72 sps:$4 sm:$0xff]  }
 0x298   : > { %4304 = vmatpush1.bf16.msra.mxu0 %v5755_v55  ;;  %v5872_v55 = vld [vmem:[#allocation8 + $0x10] ss:$72 sps:$4 sm:$0xff]  }
 0x299   : > { %4305 = vmatprep.subr.bf16.mxu0 %v5763_v56  ;;  %v5877_v56 = vld [vmem:[#allocation8 + $0xa4] ss:$72 sps:$4 sm:$0xff]  }
 0x29c   : > { %4306 = vmatpush1.bf16.msra.mxu0 %v5761_v57  ;;  %v5875_v57 = vld [vmem:[#allocation8 + $0xa0] ss:$72 sps:$4 sm:$0xff]  }
 0x29d   : > { %4307 = vmatprep.subr.bf16.mxu0 %v5769_v58  ;;  %v5880_v58 = vld [vmem:[#allocation8 + $0x134] ss:$72 sps:$4 sm:$0xff]  }
 0x2a0   : > { %4308 = vmatpush1.bf16.msra.mxu0 %v5767_v59  ;;  %v5878_v59 = vld [vmem:[#allocation8 + $0x130] ss:$72 sps:$4 sm:$0xff]  }
 0x2a1   : > { %4309 = vmatprep.subr.bf16.mxu0 %v5775_v60  ;;  %v5883_v60 = vld [vmem:[#allocation8 + $0x1c4] ss:$72 sps:$4 sm:$0xff]  }
 0x2a4   : > { %4310 = vmatpush1.bf16.msra.mxu0 %v5773_v61  ;;  %v5881_v61 = vld [vmem:[#allocation8 + $0x1c0] ss:$72 sps:$4 sm:$0xff]  }
 0x2a5   : > { %4311 = vmatprep.subr.bf16.mxu0 %v5781_v62  ;;  %v5886_v62 = vld [vmem:[#allocation8 + $0x254] ss:$72 sps:$4 sm:$0xff]  }
 0x2a8   : > { %4312 = vmatpush1.bf16.msra.mxu0 %v5779_v63  ;;  %v5884_v63 = vld [vmem:[#allocation8 + $0x250] ss:$72 sps:$4 sm:$0xff]  }
 0x2a9   : > { %4313 = vmatprep.subr.bf16.mxu0 %v5787_v0  ;;  %v5889_v0 = vld [vmem:[#allocation8 + $0x2e4] ss:$72 sps:$4 sm:$0xff]  }
 0x2ac   : > { %4314 = vmatpush1.bf16.msra.mxu0 %v5785_v1  ;;  %v5887_v1 = vld [vmem:[#allocation8 + $0x2e0] ss:$72 sps:$4 sm:$0xff]  }
 0x2ad   : > { %4315 = vmatprep.subr.bf16.mxu0 %v5793_v2  ;;  %v5892_v2 = vld [vmem:[#allocation8 + $0x374] ss:$72 sps:$4 sm:$0xff]  }
 0x2b0   : > { %4316 = vmatpush1.bf16.msra.mxu0 %v5791_v3  ;;  %v5890_v3 = vld [vmem:[#allocation8 + $0x370] ss:$72 sps:$4 sm:$0xff]  }
 0x2b1   : > { %4317 = vmatprep.subr.bf16.mxu0 %v5799_v4  ;;  %v5895_v4 = vld [vmem:[#allocation8 + $0x404] ss:$72 sps:$4 sm:$0xff]  }
 0x2b4   : > { %4318 = vmatpush1.bf16.msra.mxu0 %v5797_v5  ;;  %v5893_v5 = vld [vmem:[#allocation8 + $0x400] ss:$72 sps:$4 sm:$0xff]  }
 0x2b5   : > { %4319 = vmatprep.subr.bf16.mxu0 %v5805_v6  ;;  %v5898_v6 = vld [vmem:[#allocation8 + $0x494] ss:$72 sps:$4 sm:$0xff]  }
 0x2b8   : > { %4320 = vmatpush1.bf16.msra.mxu0 %v5803_v7  ;;  %v5896_v7 = vld [vmem:[#allocation8 + $0x490] ss:$72 sps:$4 sm:$0xff]  }
 0x2b9   : > { %4321 = vmatprep.subr.bf16.mxu0 %v5811_v8  ;;  %v5901_v8 = vld [vmem:[#allocation8 + $0x524] ss:$72 sps:$4 sm:$0xff]  }
 0x2bc   : > { %4322 = vmatpush1.bf16.msra.mxu0 %v5809_v9  ;;  %v5899_v9 = vld [vmem:[#allocation8 + $0x520] ss:$72 sps:$4 sm:$0xff]  }
 0x2bd   : > { %4323 = vmatprep.subr.bf16.mxu0 %v5817_v10  ;;  %v5904_v10 = vld [vmem:[#allocation8 + $0x5b4] ss:$72 sps:$4 sm:$0xff]  }
 0x2c0   : > { %4324 = vmatpush1.bf16.msra.mxu0 %v5815_v11  ;;  %v5902_v11 = vld [vmem:[#allocation8 + $0x5b0] ss:$72 sps:$4 sm:$0xff]  }
 0x2c1   : > { %4325 = vmatprep.subr.bf16.mxu0 %v5823_v14  ;;  %v5910_v14 = vld [vmem:[#allocation8 + $0x6d4] ss:$72 sps:$4 sm:$0xff]  }
 0x2c4   : > { %4326 = vmatpush1.bf16.msra.mxu0 %v5821_v15  ;;  %v5908_v15 = vld [vmem:[#allocation8 + $0x6d0] ss:$72 sps:$4 sm:$0xff]  }
 0x35a   : > { %v2212_v17 = vpop.f32.mrb[0].mxu0 }
 0x35b   : > { %v2214_v18 = vpop.f32.mrb[1].mxu0 }
 0x35c   : > { %v2216_v19 = vpop.f32.mrb[2].mxu0 }
 0x35d   : > { %v6646_v20 = vpack.c.bf16 %v2216_v19, %v2212_v17  ;;  %v2218_v21 = vpop.f32.mrb[3].mxu0  ;;  %v5911_v17 = vld [vmem:[#allocation8 + $0x760] ss:$72 sps:$4 sm:$0xff]   ;;  %v5914_v19 = vld [vmem:[#allocation8 + $0x7f0] ss:$72 sps:$4 sm:$0xff]  }
 0x35e   : > { %v6648_v22 = vpack.c.bf16 %v2218_v21, %v2214_v18  ;;  %v5916_v18 = vld [vmem:[#allocation8 + $0x7f4] ss:$72 sps:$4 sm:$0xff]   ;;  %v5919_v21 = vld [vmem:[#allocation8 + $0x884] ss:$72 sps:$4 sm:$0xff]  }
 0x360   : > { %3983 = vmatprep.mubr.bf16.mxu1 %v6648_v22  ;;  %4327 = vmatprep.mubr.bf16.mxu0 %v6648_v22 }
 0x361   : > { %3984 = vmatmul.mubr.bf16.vlgmr.msra.gmra.mrb[0].mxu1 %v6646_v20  ;;  %4328 = vmatmul.mubr.bf16.vlgmr.msra.gmra.mrb[4].mxu0 %v6646_v20 }
 0x362   : > { %3995 = vmatpush1.bf16.msra.mxu1 %v5824_v23  ;;  %4026 = vmatprep.mubr.bf16.mxu1 %v6648_v22  ;;  %v5917_v23 = vld [vmem:[#allocation8 + $0x880] ss:$72 sps:$4 sm:$0xff]  }
 0x363   : > { %3996 = vmatprep.subr.bf16.mxu1 %v5829_v24  ;;  %v5922_v24 = vld [vmem:[#allocation8 + $0x1c] ss:$72 sps:$4 sm:$0xff]  }
 0x366   : > { %3997 = vmatpush1.bf16.msra.mxu1 %v5827_v25  ;;  %v5920_v25 = vld [vmem:[#allocation8 + $0x18] ss:$72 sps:$4 sm:$0xff]  }
 0x367   : > { %3998 = vmatprep.subr.bf16.mxu1 %v5832_v26  ;;  %v5925_v26 = vld [vmem:[#allocation8 + $0xac] ss:$72 sps:$4 sm:$0xff]  }
 0x36a   : > { %3999 = vmatpush1.bf16.msra.mxu1 %v5830_v27  ;;  %v5923_v27 = vld [vmem:[#allocation8 + $0xa8] ss:$72 sps:$4 sm:$0xff]  }
 0x36b   : > { %4000 = vmatprep.subr.bf16.mxu1 %v5835_v28  ;;  %v5928_v28 = vld [vmem:[#allocation8 + $0x13c] ss:$72 sps:$4 sm:$0xff]  }
 0x36e   : > { %4001 = vmatpush1.bf16.msra.mxu1 %v5833_v29  ;;  %v5926_v29 = vld [vmem:[#allocation8 + $0x138] ss:$72 sps:$4 sm:$0xff]  }
 0x36f   : > { %4002 = vmatprep.subr.bf16.mxu1 %v5838_v30  ;;  %v5931_v30 = vld [vmem:[#allocation8 + $0x1cc] ss:$72 sps:$4 sm:$0xff]  }
 0x372   : > { %4003 = vmatpush1.bf16.msra.mxu1 %v5836_v31  ;;  %v5929_v31 = vld [vmem:[#allocation8 + $0x1c8] ss:$72 sps:$4 sm:$0xff]  }
 0x373   : > { %4004 = vmatprep.subr.bf16.mxu1 %v5841_v32  ;;  %v5934_v32 = vld [vmem:[#allocation8 + $0x25c] ss:$72 sps:$4 sm:$0xff]  }
 0x376   : > { %4005 = vmatpush1.bf16.msra.mxu1 %v5839_v33  ;;  %v5932_v33 = vld [vmem:[#allocation8 + $0x258] ss:$72 sps:$4 sm:$0xff]  }
 0x377   : > { %4006 = vmatprep.subr.bf16.mxu1 %v5844_v34  ;;  %v5937_v34 = vld [vmem:[#allocation8 + $0x2ec] ss:$72 sps:$4 sm:$0xff]  }
 0x37a   : > { %4007 = vmatpush1.bf16.msra.mxu1 %v5842_v35  ;;  %v5935_v35 = vld [vmem:[#allocation8 + $0x2e8] ss:$72 sps:$4 sm:$0xff]  }
 0x37b   : > { %4008 = vmatprep.subr.bf16.mxu1 %v5847_v36  ;;  %v5940_v36 = vld [vmem:[#allocation8 + $0x37c] ss:$72 sps:$4 sm:$0xff]  }
 0x37e   : > { %4009 = vmatpush1.bf16.msra.mxu1 %v5845_v37  ;;  %v5938_v37 = vld [vmem:[#allocation8 + $0x378] ss:$72 sps:$4 sm:$0xff]  }
 0x37f   : > { %4010 = vmatprep.subr.bf16.mxu1 %v5850_v38  ;;  %v5943_v38 = vld [vmem:[#allocation8 + $0x40c] ss:$72 sps:$4 sm:$0xff]  }
 0x382   : > { %4011 = vmatpush1.bf16.msra.mxu1 %v5848_v39  ;;  %v5941_v39 = vld [vmem:[#allocation8 + $0x408] ss:$72 sps:$4 sm:$0xff]  }
 0x383   : > { %4012 = vmatprep.subr.bf16.mxu1 %v5853_v40  ;;  %v5946_v40 = vld [vmem:[#allocation8 + $0x49c] ss:$72 sps:$4 sm:$0xff]  }
 0x386   : > { %4013 = vmatpush1.bf16.msra.mxu1 %v5851_v41  ;;  %v5944_v41 = vld [vmem:[#allocation8 + $0x498] ss:$72 sps:$4 sm:$0xff]  }
 0x387   : > { %4014 = vmatprep.subr.bf16.mxu1 %v5856_v42  ;;  %v5949_v42 = vld [vmem:[#allocation8 + $0x52c] ss:$72 sps:$4 sm:$0xff]  }
 0x38a   : > { %4015 = vmatpush1.bf16.msra.mxu1 %v5854_v43  ;;  %v5947_v43 = vld [vmem:[#allocation8 + $0x528] ss:$72 sps:$4 sm:$0xff]  }
 0x38b   : > { %4016 = vmatprep.subr.bf16.mxu1 %v5859_v44  ;;  %v5952_v44 = vld [vmem:[#allocation8 + $0x5bc] ss:$72 sps:$4 sm:$0xff]  }
 0x38e   : > { %4017 = vmatpush1.bf16.msra.mxu1 %v5857_v45  ;;  %v5950_v45 = vld [vmem:[#allocation8 + $0x5b8] ss:$72 sps:$4 sm:$0xff]  }
 0x38f   : > { %4018 = vmatprep.subr.bf16.mxu1 %v5862_v46  ;;  %v5955_v46 = vld [vmem:[#allocation8 + $0x64c] ss:$72 sps:$4 sm:$0xff]  }
 0x392   : > { %4019 = vmatpush1.bf16.msra.mxu1 %v5860_v47  ;;  %v5953_v47 = vld [vmem:[#allocation8 + $0x648] ss:$72 sps:$4 sm:$0xff]  }
 0x393   : > { %4020 = vmatprep.subr.bf16.mxu1 %v5865_v48  ;;  %v5958_v48 = vld [vmem:[#allocation8 + $0x6dc] ss:$72 sps:$4 sm:$0xff]  }
 0x396   : > { %4021 = vmatpush1.bf16.msra.mxu1 %v5863_v49  ;;  %v5956_v49 = vld [vmem:[#allocation8 + $0x6d8] ss:$72 sps:$4 sm:$0xff]  }
 0x397   : > { %4022 = vmatprep.subr.bf16.mxu1 %v5868_v50  ;;  %v5961_v50 = vld [vmem:[#allocation8 + $0x76c] ss:$72 sps:$4 sm:$0xff]  }
 0x39a   : > { %4023 = vmatpush1.bf16.msra.mxu1 %v5866_v51  ;;  %v5959_v51 = vld [vmem:[#allocation8 + $0x768] ss:$72 sps:$4 sm:$0xff]  }
 0x39b   : > { %4024 = vmatprep.subr.bf16.mxu1 %v5871_v52  ;;  %v5964_v52 = vld [vmem:[#allocation8 + $0x7fc] ss:$72 sps:$4 sm:$0xff]  }
 0x39e   : > { %4025 = vmatpush1.bf16.msra.mxu1 %v5869_v53  ;;  %v5962_v53 = vld [vmem:[#allocation8 + $0x7f8] ss:$72 sps:$4 sm:$0xff]  }
 0x39f   : > { %4037 = vmatprep.subr.bf16.mxu1 %v5874_v54  ;;  %v5967_v54 = vld [vmem:[#allocation8 + $0x88c] ss:$72 sps:$4 sm:$0xff]  }
 0x3a1   : > { %4027 = vmatmul.mubr.bf16.vlgmr.msra.gmra.mrb[4].mxu1 %v6646_v20 }
 0x3a2   : > { %4038 = vmatpush1.bf16.msra.mxu1 %v5872_v55  ;;  %4069 = vmatprep.mubr.bf16.mxu1 %v6648_v22  ;;  %v5965_v55 = vld [vmem:[#allocation8 + $0x888] ss:$72 sps:$4 sm:$0xff]  }
 0x3a3   : > { %4039 = vmatprep.subr.bf16.mxu1 %v5877_v56  ;;  %v5970_v56 = vld [vmem:[#allocation8 + $0x24] ss:$72 sps:$4 sm:$0xff]  }
 0x3a6   : > { %4040 = vmatpush1.bf16.msra.mxu1 %v5875_v57  ;;  %v5968_v57 = vld [vmem:[#allocation8 + $0x20] ss:$72 sps:$4 sm:$0xff]  }
 0x3a7   : > { %4041 = vmatprep.subr.bf16.mxu1 %v5880_v58  ;;  %v5973_v58 = vld [vmem:[#allocation8 + $0xb4] ss:$72 sps:$4 sm:$0xff]  }
 0x3aa   : > { %4042 = vmatpush1.bf16.msra.mxu1 %v5878_v59  ;;  %v5971_v59 = vld [vmem:[#allocation8 + $0xb0] ss:$72 sps:$4 sm:$0xff]  }
 0x3ab   : > { %4043 = vmatprep.subr.bf16.mxu1 %v5883_v60  ;;  %v5976_v60 = vld [vmem:[#allocation8 + $0x144] ss:$72 sps:$4 sm:$0xff]  }
 0x3ae   : > { %4044 = vmatpush1.bf16.msra.mxu1 %v5881_v61  ;;  %v5974_v61 = vld [vmem:[#allocation8 + $0x140] ss:$72 sps:$4 sm:$0xff]  }
 0x3af   : > { %4045 = vmatprep.subr.bf16.mxu1 %v5886_v62  ;;  %v5979_v62 = vld [vmem:[#allocation8 + $0x1d4] ss:$72 sps:$4 sm:$0xff]  }
 0x3b2   : > { %4046 = vmatpush1.bf16.msra.mxu1 %v5884_v63  ;;  %v5977_v63 = vld [vmem:[#allocation8 + $0x1d0] ss:$72 sps:$4 sm:$0xff]  }
 0x3b3   : > { %4047 = vmatprep.subr.bf16.mxu1 %v5889_v0  ;;  %v5982_v0 = vld [vmem:[#allocation8 + $0x264] ss:$72 sps:$4 sm:$0xff]  }
 0x3b6   : > { %4048 = vmatpush1.bf16.msra.mxu1 %v5887_v1  ;;  %v5980_v1 = vld [vmem:[#allocation8 + $0x260] ss:$72 sps:$4 sm:$0xff]  }
 0x3b7   : > { %4049 = vmatprep.subr.bf16.mxu1 %v5892_v2  ;;  %v5985_v2 = vld [vmem:[#allocation8 + $0x2f4] ss:$72 sps:$4 sm:$0xff]  }
 0x3ba   : > { %4050 = vmatpush1.bf16.msra.mxu1 %v5890_v3  ;;  %v5983_v3 = vld [vmem:[#allocation8 + $0x2f0] ss:$72 sps:$4 sm:$0xff]  }
 0x3bb   : > { %4051 = vmatprep.subr.bf16.mxu1 %v5895_v4  ;;  %v5988_v4 = vld [vmem:[#allocation8 + $0x384] ss:$72 sps:$4 sm:$0xff]  }
 0x3be   : > { %4052 = vmatpush1.bf16.msra.mxu1 %v5893_v5 }
 0x3bf   : > { %4053 = vmatprep.subr.bf16.mxu1 %v5898_v6 }
 0x3c2   : > { %4054 = vmatpush1.bf16.msra.mxu1 %v5896_v7 }
 0x3c3   : > { %4055 = vmatprep.subr.bf16.mxu1 %v5901_v8 }
 0x3c6   : > { %4056 = vmatpush1.bf16.msra.mxu1 %v5899_v9 }
 0x3c7   : > { %4057 = vmatprep.subr.bf16.mxu1 %v5904_v10 }
 0x3ca   : > { %4058 = vmatpush1.bf16.msra.mxu1 %v5902_v11  ;;  %v5986_v11 = vld [vmem:[#allocation8 + $0x380] ss:$72 sps:$4 sm:$0xff]  }
 0x3cb   : > { %4059 = vmatprep.subr.bf16.mxu1 %v5907_v12 }
 0x3ce   : > { %4060 = vmatpush1.bf16.msra.mxu1 %v5905_v13 }
 0x3cf   : > { %4061 = vmatprep.subr.bf16.mxu1 %v5910_v14 }
 0x3d2   : > { %4062 = vmatpush1.bf16.msra.mxu1 %v5908_v15 }
 0x3d3   : > { %4063 = vmatprep.subr.bf16.mxu1 %v5913_v16  ;;  %v5991_v16 = vld [vmem:[#allocation8 + $0x414] ss:$72 sps:$4 sm:$0xff]  }
 0x3d6   : > { %4064 = vmatpush1.bf16.msra.mxu1 %v5911_v17 }
 0x3d7   : > { %4065 = vmatprep.subr.bf16.mxu1 %v5916_v18 }
 0x3da   : > { %4066 = vmatpush1.bf16.msra.mxu1 %v5914_v19  ;;  %v5989_v19 = vld [vmem:[#allocation8 + $0x410] ss:$72 sps:$4 sm:$0xff]  }
 0x3db   : > { %4067 = vmatprep.subr.bf16.mxu1 %v5919_v21  ;;  %v5994_v21 = vld [vmem:[#allocation8 + $0x4a4] ss:$72 sps:$4 sm:$0xff]  }
 0x3de   : > { %4068 = vmatpush1.bf16.msra.mxu1 %v5917_v23  ;;  %v5992_v23 = vld [vmem:[#allocation8 + $0x4a0] ss:$72 sps:$4 sm:$0xff]  }
 0x3df   : > { %4080 = vmatprep.subr.bf16.mxu1 %v5922_v24  ;;  %v5997_v24 = vld [vmem:[#allocation8 + $0x534] ss:$72 sps:$4 sm:$0xff]  }
 0x3e1   : > { %4070 = vmatmul.mubr.bf16.vlgmr.msra.gmra.mrb[8].mxu1 %v6646_v20 }
 0x3e2   : > { %4081 = vmatpush1.bf16.msra.mxu1 %v5920_v25  ;;  %4112 = vmatprep.mubr.bf16.mxu1 %v6648_v22  ;;  %v5995_v25 = vld [vmem:[#allocation8 + $0x530] ss:$72 sps:$4 sm:$0xff]  }
 0x3e3   : > { %4082 = vmatprep.subr.bf16.mxu1 %v5925_v26  ;;  %v6000_v26 = vld [vmem:[#allocation8 + $0x5c4] ss:$72 sps:$4 sm:$0xff]  }
 0x3e6   : > { %4083 = vmatpush1.bf16.msra.mxu1 %v5923_v27  ;;  %v5998_v27 = vld [vmem:[#allocation8 + $0x5c0] ss:$72 sps:$4 sm:$0xff]  }
 0x3e7   : > { %4084 = vmatprep.subr.bf16.mxu1 %v5928_v28  ;;  %v6003_v28 = vld [vmem:[#allocation8 + $0x654] ss:$72 sps:$4 sm:$0xff]  }
 0x3ea   : > { %4085 = vmatpush1.bf16.msra.mxu1 %v5926_v29  ;;  %v6001_v29 = vld [vmem:[#allocation8 + $0x650] ss:$72 sps:$4 sm:$0xff]  }
 0x3eb   : > { %4086 = vmatprep.subr.bf16.mxu1 %v5931_v30  ;;  %v6006_v30 = vld [vmem:[#allocation8 + $0x6e4] ss:$72 sps:$4 sm:$0xff]  }
 0x3ee   : > { %4087 = vmatpush1.bf16.msra.mxu1 %v5929_v31  ;;  %v6004_v31 = vld [vmem:[#allocation8 + $0x6e0] ss:$72 sps:$4 sm:$0xff]  }
 0x3ef   : > { %4088 = vmatprep.subr.bf16.mxu1 %v5934_v32  ;;  %v6009_v32 = vld [vmem:[#allocation8 + $0x774] ss:$72 sps:$4 sm:$0xff]  }
 0x3f2   : > { %4089 = vmatpush1.bf16.msra.mxu1 %v5932_v33  ;;  %v6007_v33 = vld [vmem:[#allocation8 + $0x770] ss:$72 sps:$4 sm:$0xff]  }
 0x3f3   : > { %4090 = vmatprep.subr.bf16.mxu1 %v5937_v34  ;;  %v6012_v34 = vld [vmem:[#allocation8 + $0x804] ss:$72 sps:$4 sm:$0xff]  }
 0x3f6   : > { %4091 = vmatpush1.bf16.msra.mxu1 %v5935_v35  ;;  %v6010_v35 = vld [vmem:[#allocation8 + $0x800] ss:$72 sps:$4 sm:$0xff]  }
 0x3f7   : > { %4092 = vmatprep.subr.bf16.mxu1 %v5940_v36  ;;  %v6015_v36 = vld [vmem:[#allocation8 + $0x894] ss:$72 sps:$4 sm:$0xff]  }
 0x3fa   : > { %4093 = vmatpush1.bf16.msra.mxu1 %v5938_v37  ;;  %v6013_v37 = vld [vmem:[#allocation8 + $0x890] ss:$72 sps:$4 sm:$0xff]  }
 0x3fb   : > { %4094 = vmatprep.subr.bf16.mxu1 %v5943_v38  ;;  %v6018_v38 = vld [vmem:[#allocation8 + $0x2c] ss:$72 sps:$4 sm:$0xff]  }
 0x3fe   : > { %4095 = vmatpush1.bf16.msra.mxu1 %v5941_v39  ;;  %v6016_v39 = vld [vmem:[#allocation8 + $0x28] ss:$72 sps:$4 sm:$0xff]  }
 0x3ff   : > { %4096 = vmatprep.subr.bf16.mxu1 %v5946_v40  ;;  %v6021_v40 = vld [vmem:[#allocation8 + $0xbc] ss:$72 sps:$4 sm:$0xff]  }
 0x402   : > { %4097 = vmatpush1.bf16.msra.mxu1 %v5944_v41  ;;  %v6019_v41 = vld [vmem:[#allocation8 + $0xb8] ss:$72 sps:$4 sm:$0xff]  }
 0x403   : > { %4098 = vmatprep.subr.bf16.mxu1 %v5949_v42  ;;  %v6024_v42 = vld [vmem:[#allocation8 + $0x14c] ss:$72 sps:$4 sm:$0xff]  }
 0x406   : > { %4099 = vmatpush1.bf16.msra.mxu1 %v5947_v43  ;;  %v6022_v43 = vld [vmem:[#allocation8 + $0x148] ss:$72 sps:$4 sm:$0xff]  }
 0x407   : > { %4100 = vmatprep.subr.bf16.mxu1 %v5952_v44  ;;  %v6027_v44 = vld [vmem:[#allocation8 + $0x1dc] ss:$72 sps:$4 sm:$0xff]  }
 0x40a   : > { %4101 = vmatpush1.bf16.msra.mxu1 %v5950_v45  ;;  %v6025_v45 = vld [vmem:[#allocation8 + $0x1d8] ss:$72 sps:$4 sm:$0xff]  }
 0x40b   : > { %4102 = vmatprep.subr.bf16.mxu1 %v5955_v46  ;;  %v6030_v46 = vld [vmem:[#allocation8 + $0x26c] ss:$72 sps:$4 sm:$0xff]  }
 0x40e   : > { %4103 = vmatpush1.bf16.msra.mxu1 %v5953_v47  ;;  %v6028_v47 = vld [vmem:[#allocation8 + $0x268] ss:$72 sps:$4 sm:$0xff]  }
 0x40f   : > { %4104 = vmatprep.subr.bf16.mxu1 %v5958_v48  ;;  %v6033_v48 = vld [vmem:[#allocation8 + $0x2fc] ss:$72 sps:$4 sm:$0xff]  }
 0x412   : > { %4105 = vmatpush1.bf16.msra.mxu1 %v5956_v49  ;;  %v6031_v49 = vld [vmem:[#allocation8 + $0x2f8] ss:$72 sps:$4 sm:$0xff]  }
 0x413   : > { %4106 = vmatprep.subr.bf16.mxu1 %v5961_v50  ;;  %v6036_v50 = vld [vmem:[#allocation8 + $0x38c] ss:$72 sps:$4 sm:$0xff]  }
 0x416   : > { %4107 = vmatpush1.bf16.msra.mxu1 %v5959_v51 }
 0x417   : > { %4108 = vmatprep.subr.bf16.mxu1 %v5964_v52 }
 0x41a   : > { %4109 = vmatpush1.bf16.msra.mxu1 %v5962_v53 }
 0x41b   : > { %4110 = vmatprep.subr.bf16.mxu1 %v5967_v54  ;;  %v6034_v54 = vld [vmem:[#allocation8 + $0x388] ss:$72 sps:$4 sm:$0xff]  }
 0x41e   : > { %4111 = vmatpush1.bf16.msra.mxu1 %v5965_v55 }
 0x41f   : > { %4123 = vmatprep.subr.bf16.mxu1 %v5970_v56 }
 0x421   : > { %4113 = vmatmul.mubr.bf16.vlgmr.msra.gmra.mrb[12].mxu1 %v6646_v20 }
 0x422   : > { %4124 = vmatpush1.bf16.msra.mxu1 %v5968_v57  ;;  %4155 = vmatprep.mubr.bf16.mxu1 %v6648_v22  ;;  %v6039_v57 = vld [vmem:[#allocation8 + $0x41c] ss:$72 sps:$4 sm:$0xff]  }
 0x423   : > { %4125 = vmatprep.subr.bf16.mxu1 %v5973_v58 }
 0x426   : > { %4126 = vmatpush1.bf16.msra.mxu1 %v5971_v59  ;;  %v6037_v59 = vld [vmem:[#allocation8 + $0x418] ss:$72 sps:$4 sm:$0xff]  }
 0x427   : > { %4127 = vmatprep.subr.bf16.mxu1 %v5976_v60  ;;  %v6042_v60 = vld [vmem:[#allocation8 + $0x4ac] ss:$72 sps:$4 sm:$0xff]  }
 0x42a   : > { %4128 = vmatpush1.bf16.msra.mxu1 %v5974_v61  ;;  %v6040_v61 = vld [vmem:[#allocation8 + $0x4a8] ss:$72 sps:$4 sm:$0xff]  }
 0x42b   : > { %4129 = vmatprep.subr.bf16.mxu1 %v5979_v62  ;;  %v6045_v62 = vld [vmem:[#allocation8 + $0x53c] ss:$72 sps:$4 sm:$0xff]  }
 0x42e   : > { %4130 = vmatpush1.bf16.msra.mxu1 %v5977_v63  ;;  %v6043_v63 = vld [vmem:[#allocation8 + $0x538] ss:$72 sps:$4 sm:$0xff]  }
 0x42f   : > { %4131 = vmatprep.subr.bf16.mxu1 %v5982_v0  ;;  %v6048_v0 = vld [vmem:[#allocation8 + $0x5cc] ss:$72 sps:$4 sm:$0xff]  }
 0x432   : > { %4132 = vmatpush1.bf16.msra.mxu1 %v5980_v1  ;;  %v6046_v1 = vld [vmem:[#allocation8 + $0x5c8] ss:$72 sps:$4 sm:$0xff]  }
 0x433   : > { %4133 = vmatprep.subr.bf16.mxu1 %v5985_v2  ;;  %v6051_v2 = vld [vmem:[#allocation8 + $0x65c] ss:$72 sps:$4 sm:$0xff]  }
 0x434   : > { %v6661_v5 = vpop.f32.mrb[0].mxu1  ;;  %v6663_v6 = vpop.f32.mrb[4].mxu0 }
 0x435   : > { %v6665_v7 = vpop.f32.mrb[1].mxu1  ;;  %v6667_v8 = vpop.f32.mrb[5].mxu0 }
 0x436   : > { %4134 = vmatpush1.bf16.msra.mxu1 %v5983_v3  ;;  %v6669_v9 = vpop.f32.mrb[2].mxu1  ;;  %v6671_v10 = vpop.f32.mrb[6].mxu0  ;;  %v6049_v3 = vld [vmem:[#allocation8 + $0x658] ss:$72 sps:$4 sm:$0xff]  }
 0x437   : > { %v4338_v12 = vpack.c.bf16 %v6669_v9, %v6661_v5  ;;  %v4370_v13 = vpack.c.bf16 %v6671_v10, %v6663_v6  ;;  %v6677_v14 = vpop.f32.mrb[3].mxu1  ;;  %v6679_v15 = vpop.f32.mrb[7].mxu0  ;;  %4135 = vmatprep.subr.bf16.mxu1 %v5988_v4  ;;  %v6054_v4 = vld [vmem:[#allocation8 + $0x6ec] ss:$72 sps:$4 sm:$0xff]  }
 0x438   : > { %v4339_v17 = vpack.c.bf16 %v6677_v14, %v6665_v7  ;;  %v4371_v18 = vpack.c.bf16 %v6679_v15, %v6667_v8  ;;  %v6171_v8 = vld [vmem:[#allocation9 + $0x30] ss:$8 sps:$4 sm:$0xff]  }
 0x43a   : > { %4136 = vmatpush1.bf16.msra.mxu1 %v5986_v11  ;;  %v6052_v11 = vld [vmem:[#allocation8 + $0x6e8] ss:$72 sps:$4 sm:$0xff]  }
 0x43b   : > { %4137 = vmatprep.subr.bf16.mxu1 %v5991_v16  ;;  %v6057_v16 = vld [vmem:[#allocation8 + $0x77c] ss:$72 sps:$4 sm:$0xff]  }
 0x43e   : > { %4138 = vmatpush1.bf16.msra.mxu1 %v5989_v19  ;;  %v6055_v19 = vld [vmem:[#allocation8 + $0x778] ss:$72 sps:$4 sm:$0xff]  }
 0x43f   : > { %4139 = vmatprep.subr.bf16.mxu1 %v5994_v21  ;;  %v6060_v21 = vld [vmem:[#allocation8 + $0x80c] ss:$72 sps:$4 sm:$0xff]  }
 0x442   : > { %4140 = vmatpush1.bf16.msra.mxu1 %v5992_v23  ;;  %v6058_v23 = vld [vmem:[#allocation8 + $0x808] ss:$72 sps:$4 sm:$0xff]  }
 0x443   : > { %4141 = vmatprep.subr.bf16.mxu1 %v5997_v24  ;;  %v6063_v24 = vld [vmem:[#allocation8 + $0x89c] ss:$72 sps:$4 sm:$0xff]  }
 0x446   : > { %4142 = vmatpush1.bf16.msra.mxu1 %v5995_v25  ;;  %v6061_v25 = vld [vmem:[#allocation8 + $0x898] ss:$72 sps:$4 sm:$0xff]  }
 0x447   : > { %4143 = vmatprep.subr.bf16.mxu1 %v6000_v26  ;;  %v6066_v26 = vld [vmem:[#allocation8 + $0x34] ss:$72 sps:$4 sm:$0xff]  }
 0x44a   : > { %4144 = vmatpush1.bf16.msra.mxu1 %v5998_v27  ;;  %v6064_v27 = vld [vmem:[#allocation8 + $0x30] ss:$72 sps:$4 sm:$0xff]  }
 0x44b   : > { %4145 = vmatprep.subr.bf16.mxu1 %v6003_v28  ;;  %v6069_v28 = vld [vmem:[#allocation8 + $0xc4] ss:$72 sps:$4 sm:$0xff]  }
 0x44e   : > { %4146 = vmatpush1.bf16.msra.mxu1 %v6001_v29  ;;  %v6067_v29 = vld [vmem:[#allocation8 + $0xc0] ss:$72 sps:$4 sm:$0xff]  }
 0x44f   : > { %4147 = vmatprep.subr.bf16.mxu1 %v6006_v30  ;;  %v6072_v30 = vld [vmem:[#allocation8 + $0x154] ss:$72 sps:$4 sm:$0xff]  }
 0x452   : > { %4148 = vmatpush1.bf16.msra.mxu1 %v6004_v31  ;;  %v6070_v31 = vld [vmem:[#allocation8 + $0x150] ss:$72 sps:$4 sm:$0xff]  }
 0x453   : > { %4149 = vmatprep.subr.bf16.mxu1 %v6009_v32  ;;  %v6075_v32 = vld [vmem:[#allocation8 + $0x1e4] ss:$72 sps:$4 sm:$0xff]  }
 0x456   : > { %4150 = vmatpush1.bf16.msra.mxu1 %v6007_v33  ;;  %v6073_v33 = vld [vmem:[#allocation8 + $0x1e0] ss:$72 sps:$4 sm:$0xff]  }
 0x457   : > { %4151 = vmatprep.subr.bf16.mxu1 %v6012_v34  ;;  %v6078_v34 = vld [vmem:[#allocation8 + $0x274] ss:$72 sps:$4 sm:$0xff]  }
 0x45a   : > { %4152 = vmatpush1.bf16.msra.mxu1 %v6010_v35  ;;  %v6076_v35 = vld [vmem:[#allocation8 + $0x270] ss:$72 sps:$4 sm:$0xff]  }
 0x45b   : > { %4153 = vmatprep.subr.bf16.mxu1 %v6015_v36  ;;  %v6081_v36 = vld [vmem:[#allocation8 + $0x304] ss:$72 sps:$4 sm:$0xff]  }
 0x45e   : > { %4154 = vmatpush1.bf16.msra.mxu1 %v6013_v37  ;;  %v6079_v37 = vld [vmem:[#allocation8 + $0x300] ss:$72 sps:$4 sm:$0xff]  }
 0x45f   : > { %4166 = vmatprep.subr.bf16.mxu1 %v6018_v38  ;;  %v6084_v38 = vld [vmem:[#allocation8 + $0x394] ss:$72 sps:$4 sm:$0xff]  }
 0x461   : > { %4156 = vmatmul.mubr.bf16.vlgmr.msra.gmra.mrb[16].mxu1 %v6646_v20 }
 0x462   : > { %4167 = vmatpush1.bf16.msra.mxu1 %v6016_v39  ;;  %4198 = vmatprep.mubr.bf16.mxu1 %v6648_v22 }
 0x463   : > { %4168 = vmatprep.subr.bf16.mxu1 %v6021_v40 }
 0x466   : > { %4169 = vmatpush1.bf16.msra.mxu1 %v6019_v41 }
 0x467   : > { %4170 = vmatprep.subr.bf16.mxu1 %v6024_v42  ;;  %v6082_v42 = vld [vmem:[#allocation8 + $0x390] ss:$72 sps:$4 sm:$0xff]  }
 0x46a   : > { %4171 = vmatpush1.bf16.msra.mxu1 %v6022_v43 }
 0x46b   : > { %4172 = vmatprep.subr.bf16.mxu1 %v6027_v44 }
 0x46e   : > { %4173 = vmatpush1.bf16.msra.mxu1 %v6025_v45  ;;  %v6087_v45 = vld [vmem:[#allocation8 + $0x424] ss:$72 sps:$4 sm:$0xff]  }
 0x46f   : > { %4174 = vmatprep.subr.bf16.mxu1 %v6030_v46 }
 0x472   : > { %4175 = vmatpush1.bf16.msra.mxu1 %v6028_v47  ;;  %v6085_v47 = vld [vmem:[#allocation8 + $0x420] ss:$72 sps:$4 sm:$0xff]  }
 0x473   : > { %4176 = vmatprep.subr.bf16.mxu1 %v6033_v48  ;;  %v6090_v48 = vld [vmem:[#allocation8 + $0x4b4] ss:$72 sps:$4 sm:$0xff]  }
 0x474   : > { %v6687_v51 = vpop.f32.mrb[4].mxu1 }
 0x475   : > { %v6689_v52 = vpop.f32.mrb[5].mxu1 }
 0x476   : > { %v6691_v53 = vpop.f32.mrb[6].mxu1  ;;  %4177 = vmatpush1.bf16.msra.mxu1 %v6031_v49  ;;  %v6088_v49 = vld [vmem:[#allocation8 + $0x4b0] ss:$72 sps:$4 sm:$0xff]  }
 0x477   : > { %v4342_v55 = vpack.c.bf16 %v6691_v53, %v6687_v51  ;;  %v6695_v56 = vpop.f32.mrb[7].mxu1  ;;  %4178 = vmatprep.subr.bf16.mxu1 %v6036_v50  ;;  %v6093_v50 = vld [vmem:[#allocation8 + $0x544] ss:$72 sps:$4 sm:$0xff]  }
 0x478   : > { %v4343_v58 = vpack.c.bf16 %v6695_v56, %v6689_v52 }
 0x47a   : > { %4179 = vmatpush1.bf16.msra.mxu1 %v6034_v54  ;;  %v6091_v54 = vld [vmem:[#allocation8 + $0x540] ss:$72 sps:$4 sm:$0xff]  }
 0x47b   : > { %4180 = vmatprep.subr.bf16.mxu1 %v6039_v57  ;;  %v6096_v57 = vld [vmem:[#allocation8 + $0x5d4] ss:$72 sps:$4 sm:$0xff]  }
 0x47e   : > { %4181 = vmatpush1.bf16.msra.mxu1 %v6037_v59  ;;  %v6094_v59 = vld [vmem:[#allocation8 + $0x5d0] ss:$72 sps:$4 sm:$0xff]  }
 0x47f   : > { %4182 = vmatprep.subr.bf16.mxu1 %v6042_v60  ;;  %v6099_v60 = vld [vmem:[#allocation8 + $0x664] ss:$72 sps:$4 sm:$0xff]  }
 0x482   : > { %4183 = vmatpush1.bf16.msra.mxu1 %v6040_v61  ;;  %v6097_v61 = vld [vmem:[#allocation8 + $0x660] ss:$72 sps:$4 sm:$0xff]  }
 0x483   : > { %4184 = vmatprep.subr.bf16.mxu1 %v6045_v62  ;;  %v6102_v62 = vld [vmem:[#allocation8 + $0x6f4] ss:$72 sps:$4 sm:$0xff]  }
 0x486   : > { %4185 = vmatpush1.bf16.msra.mxu1 %v6043_v63  ;;  %v6100_v63 = vld [vmem:[#allocation8 + $0x6f0] ss:$72 sps:$4 sm:$0xff]  }
 0x487   : > { %4186 = vmatprep.subr.bf16.mxu1 %v6048_v0  ;;  %v6105_v0 = vld [vmem:[#allocation8 + $0x784] ss:$72 sps:$4 sm:$0xff]  }
 0x48a   : > { %4187 = vmatpush1.bf16.msra.mxu1 %v6046_v1  ;;  %v6103_v1 = vld [vmem:[#allocation8 + $0x780] ss:$72 sps:$4 sm:$0xff]  }
 0x48b   : > { %4188 = vmatprep.subr.bf16.mxu1 %v6051_v2  ;;  %v6108_v2 = vld [vmem:[#allocation8 + $0x814] ss:$72 sps:$4 sm:$0xff]  }
 0x48e   : > { %4189 = vmatpush1.bf16.msra.mxu1 %v6049_v3  ;;  %v6106_v3 = vld [vmem:[#allocation8 + $0x810] ss:$72 sps:$4 sm:$0xff]  }
 0x48f   : > { %4190 = vmatprep.subr.bf16.mxu1 %v6054_v4  ;;  %v6111_v4 = vld [vmem:[#allocation8 + $0x8a4] ss:$72 sps:$4 sm:$0xff]  }
 0x492   : > { %4191 = vmatpush1.bf16.msra.mxu1 %v6052_v11  ;;  %v6109_v11 = vld [vmem:[#allocation8 + $0x8a0] ss:$72 sps:$4 sm:$0xff]  }
 0x493   : > { %4192 = vmatprep.subr.bf16.mxu1 %v6057_v16  ;;  %v6114_v16 = vld [vmem:[#allocation8 + $0x3c] ss:$72 sps:$4 sm:$0xff]  }
 0x496   : > { %4193 = vmatpush1.bf16.msra.mxu1 %v6055_v19  ;;  %v6112_v19 = vld [vmem:[#allocation8 + $0x38] ss:$72 sps:$4 sm:$0xff]  }
 0x497   : > { %4194 = vmatprep.subr.bf16.mxu1 %v6060_v21  ;;  %v6117_v21 = vld [vmem:[#allocation8 + $0xcc] ss:$72 sps:$4 sm:$0xff]  }
 0x49a   : > { %4195 = vmatpush1.bf16.msra.mxu1 %v6058_v23  ;;  %v6115_v23 = vld [vmem:[#allocation8 + $0xc8] ss:$72 sps:$4 sm:$0xff]  }
 0x49b   : > { %4196 = vmatprep.subr.bf16.mxu1 %v6063_v24  ;;  %v6120_v24 = vld [vmem:[#allocation8 + $0x15c] ss:$72 sps:$4 sm:$0xff]  }
 0x49e   : > { %4197 = vmatpush1.bf16.msra.mxu1 %v6061_v25  ;;  %v6118_v25 = vld [vmem:[#allocation8 + $0x158] ss:$72 sps:$4 sm:$0xff]  }
 0x49f   : > { %4209 = vmatprep.subr.bf16.mxu1 %v6066_v26  ;;  %v6123_v26 = vld [vmem:[#allocation8 + $0x1ec] ss:$72 sps:$4 sm:$0xff]  }
 0x4a1   : > { %4199 = vmatmul.mubr.bf16.vlgmr.msra.gmra.mrb[20].mxu1 %v6646_v20 }
 0x4a2   : > { %4210 = vmatpush1.bf16.msra.mxu1 %v6064_v27  ;;  %4241 = vmatprep.mubr.bf16.mxu1 %v6648_v22  ;;  %v6121_v27 = vld [vmem:[#allocation8 + $0x1e8] ss:$72 sps:$4 sm:$0xff]  }
 0x4a3   : > { %4211 = vmatprep.subr.bf16.mxu1 %v6069_v28  ;;  %v6126_v28 = vld [vmem:[#allocation8 + $0x27c] ss:$72 sps:$4 sm:$0xff]  }
 0x4a6   : > { %4212 = vmatpush1.bf16.msra.mxu1 %v6067_v29  ;;  %v6124_v29 = vld [vmem:[#allocation8 + $0x278] ss:$72 sps:$4 sm:$0xff]  }
 0x4a7   : > { %4213 = vmatprep.subr.bf16.mxu1 %v6072_v30  ;;  %v6129_v30 = vld [vmem:[#allocation8 + $0x30c] ss:$72 sps:$4 sm:$0xff]  }
 0x4aa   : > { %4214 = vmatpush1.bf16.msra.mxu1 %v6070_v31  ;;  %v6127_v31 = vld [vmem:[#allocation8 + $0x308] ss:$72 sps:$4 sm:$0xff]  }
 0x4ab   : > { %4215 = vmatprep.subr.bf16.mxu1 %v6075_v32  ;;  %v6132_v32 = vld [vmem:[#allocation8 + $0x39c] ss:$72 sps:$4 sm:$0xff]  }
 0x4ae   : > { %4216 = vmatpush1.bf16.msra.mxu1 %v6073_v33 }
 0x4af   : > { %4217 = vmatprep.subr.bf16.mxu1 %v6078_v34 }
 0x4b2   : > { %4218 = vmatpush1.bf16.msra.mxu1 %v6076_v35  ;;  %v6130_v35 = vld [vmem:[#allocation8 + $0x398] ss:$72 sps:$4 sm:$0xff]  }
 0x4b3   : > { %4219 = vmatprep.subr.bf16.mxu1 %v6081_v36 }
 0x4b4   : > { %v6701_v39 = vpop.f32.mrb[8].mxu1 }
 0x4b5   : > { %v6703_v40 = vpop.f32.mrb[9].mxu1 }
 0x4b6   : > { %v6705_v41 = vpop.f32.mrb[10].mxu1  ;;  %4220 = vmatpush1.bf16.msra.mxu1 %v6079_v37 }
 0x4b7   : > { %v4346_v43 = vpack.c.bf16 %v6705_v41, %v6701_v39  ;;  %v6709_v44 = vpop.f32.mrb[11].mxu1  ;;  %4221 = vmatprep.subr.bf16.mxu1 %v6084_v38  ;;  %v6135_v38 = vld [vmem:[#allocation8 + $0x42c] ss:$72 sps:$4 sm:$0xff]  }
 0x4b8   : > { %v4347_v46 = vpack.c.bf16 %v6709_v44, %v6703_v40 }
 0x4ba   : > { %4222 = vmatpush1.bf16.msra.mxu1 %v6082_v42 }
 0x4bb   : > { %4223 = vmatprep.subr.bf16.mxu1 %v6087_v45  ;;  %v6133_v45 = vld [vmem:[#allocation8 + $0x428] ss:$72 sps:$4 sm:$0xff]  }
 0x4be   : > { %4224 = vmatpush1.bf16.msra.mxu1 %v6085_v47  ;;  %v6138_v47 = vld [vmem:[#allocation8 + $0x4bc] ss:$72 sps:$4 sm:$0xff]  }
 0x4bf   : > { %4225 = vmatprep.subr.bf16.mxu1 %v6090_v48  ;;  %v6136_v48 = vld [vmem:[#allocation8 + $0x4b8] ss:$72 sps:$4 sm:$0xff]  }
 0x4c2   : > { %4226 = vmatpush1.bf16.msra.mxu1 %v6088_v49  ;;  %v6141_v49 = vld [vmem:[#allocation8 + $0x54c] ss:$72 sps:$4 sm:$0xff]  }
 0x4c3   : > { %4227 = vmatprep.subr.bf16.mxu1 %v6093_v50  ;;  %v6139_v50 = vld [vmem:[#allocation8 + $0x548] ss:$72 sps:$4 sm:$0xff]  }
 0x4c6   : > { %4228 = vmatpush1.bf16.msra.mxu1 %v6091_v54  ;;  %v6144_v54 = vld [vmem:[#allocation8 + $0x5dc] ss:$72 sps:$4 sm:$0xff]  }
 0x4c7   : > { %4229 = vmatprep.subr.bf16.mxu1 %v6096_v57  ;;  %v6142_v57 = vld [vmem:[#allocation8 + $0x5d8] ss:$72 sps:$4 sm:$0xff]  }
 0x4ca   : > { %4230 = vmatpush1.bf16.msra.mxu1 %v6094_v59  ;;  %v6147_v59 = vld [vmem:[#allocation8 + $0x66c] ss:$72 sps:$4 sm:$0xff]  }
 0x4cb   : > { %4231 = vmatprep.subr.bf16.mxu1 %v6099_v60  ;;  %v6145_v60 = vld [vmem:[#allocation8 + $0x668] ss:$72 sps:$4 sm:$0xff]  }
 0x4ce   : > { %4232 = vmatpush1.bf16.msra.mxu1 %v6097_v61  ;;  %v6150_v61 = vld [vmem:[#allocation8 + $0x6fc] ss:$72 sps:$4 sm:$0xff]  }
 0x4cf   : > { %4233 = vmatprep.subr.bf16.mxu1 %v6102_v62  ;;  %v6148_v62 = vld [vmem:[#allocation8 + $0x6f8] ss:$72 sps:$4 sm:$0xff]  }
 0x4d2   : > { %4234 = vmatpush1.bf16.msra.mxu1 %v6100_v63  ;;  %v6153_v63 = vld [vmem:[#allocation8 + $0x78c] ss:$72 sps:$4 sm:$0xff]  }
 0x4d3   : > { %4235 = vmatprep.subr.bf16.mxu1 %v6105_v0  ;;  %v6151_v0 = vld [vmem:[#allocation8 + $0x788] ss:$72 sps:$4 sm:$0xff]  }
 0x4d6   : > { %4236 = vmatpush1.bf16.msra.mxu1 %v6103_v1  ;;  %v6156_v1 = vld [vmem:[#allocation8 + $0x81c] ss:$72 sps:$4 sm:$0xff]  }
 0x4d7   : > { %4237 = vmatprep.subr.bf16.mxu1 %v6108_v2  ;;  %v6154_v2 = vld [vmem:[#allocation8 + $0x818] ss:$72 sps:$4 sm:$0xff]  }
 0x4da   : > { %4238 = vmatpush1.bf16.msra.mxu1 %v6106_v3  ;;  %v6159_v3 = vld [vmem:[#allocation8 + $0x8ac] ss:$72 sps:$4 sm:$0xff]  }
 0x4db   : > { %4239 = vmatprep.subr.bf16.mxu1 %v6111_v4  ;;  %v6157_v4 = vld [vmem:[#allocation8 + $0x8a8] ss:$72 sps:$4 sm:$0xff]  }
 0x4de   : > { %4240 = vmatpush1.bf16.msra.mxu1 %v6109_v11 }
 0x4df   : > { %4252 = vmatprep.subr.bf16.mxu1 %v6114_v16 }
 0x4e1   : > { %4242 = vmatmul.mubr.bf16.vlgmr.msra.gmra.mrb[24].mxu1 %v6646_v20 }
 0x4e2   : > { %4253 = vmatpush1.bf16.msra.mxu1 %v6112_v19  ;;  %4284 = vmatprep.mubr.bf16.mxu1 %v6648_v22 }
 0x4e3   : > { %4254 = vmatprep.subr.bf16.mxu1 %v6117_v21 }
 0x4e6   : > { %4255 = vmatpush1.bf16.msra.mxu1 %v6115_v23 }
 0x4e7   : > { %4256 = vmatprep.subr.bf16.mxu1 %v6120_v24 }
 0x4ea   : > { %4257 = vmatpush1.bf16.msra.mxu1 %v6118_v25  ;;  %v6162_v25 = vld [vmem:[#allocation9] ss:$8 sps:$4 sm:$0xff]  }
 0x4eb   : > { %4258 = vmatprep.subr.bf16.mxu1 %v6123_v26  ;;  %v6163_v26 = vld [vmem:[#allocation9 + $0x14] ss:$8 sps:$4 sm:$0xff]  }
 0x4ee   : > { %4259 = vmatpush1.bf16.msra.mxu1 %v6121_v27  ;;  %v6165_v27 = vld [vmem:[#allocation9 + $0x10] ss:$8 sps:$4 sm:$0xff]  }
 0x4ef   : > { %4260 = vmatprep.subr.bf16.mxu1 %v6126_v28  ;;  %v6166_v28 = vld [vmem:[#allocation9 + $0x24] ss:$8 sps:$4 sm:$0xff]  }
 0x4f2   : > { %4261 = vmatpush1.bf16.msra.mxu1 %v6124_v29  ;;  %v6168_v29 = vld [vmem:[#allocation9 + $0x20] ss:$8 sps:$4 sm:$0xff]  }
 0x4f3   : > { %4262 = vmatprep.subr.bf16.mxu1 %v6129_v30  ;;  %v6169_v30 = vld [vmem:[#allocation9 + $0x34] ss:$8 sps:$4 sm:$0xff]  }
 0x4f4   : > { %v4114_v22 = vpop.f32.mrb[12].mxu1 }
 0x4f5   : > { %v4116_v33 = vpop.f32.mrb[13].mxu1 }
 0x4f6   : > { %v4118_v34 = vpop.f32.mrb[14].mxu1  ;;  %4263 = vmatpush1.bf16.msra.mxu1 %v6127_v31 }
 0x4f7   : > { %v4350_v36 = vpack.c.bf16 %v4118_v34, %v4114_v22  ;;  %v4120_v37 = vpop.f32.mrb[15].mxu1  ;;  %4264 = vmatprep.subr.bf16.mxu1 %v6132_v32 }
 0x4f8   : > { %v4351_v42 = vpack.c.bf16 %v4120_v37, %v4116_v33 }
 0x4fa   : > { %4265 = vmatpush1.bf16.msra.mxu1 %v6130_v35 }
 0x4fb   : > { %4266 = vmatprep.subr.bf16.mxu1 %v6135_v38 }
 0x4fe   : > { %4267 = vmatpush1.bf16.msra.mxu1 %v6133_v45 }
 0x4ff   : > { %4268 = vmatprep.subr.bf16.mxu1 %v6138_v47 }
 0x502   : > { %4269 = vmatpush1.bf16.msra.mxu1 %v6136_v48 }
 0x503   : > { %4270 = vmatprep.subr.bf16.mxu1 %v6141_v49 }
 0x506   : > { %4271 = vmatpush1.bf16.msra.mxu1 %v6139_v50 }
 0x507   : > { %4272 = vmatprep.subr.bf16.mxu1 %v6144_v54 }
 0x50a   : > { %4273 = vmatpush1.bf16.msra.mxu1 %v6142_v57 }
 0x50b   : > { %4274 = vmatprep.subr.bf16.mxu1 %v6147_v59 }
 0x50e   : > { %4275 = vmatpush1.bf16.msra.mxu1 %v6145_v60 }
 0x50f   : > { %4276 = vmatprep.subr.bf16.mxu1 %v6150_v61 }
 0x512   : > { %4277 = vmatpush1.bf16.msra.mxu1 %v6148_v62 }
 0x513   : > { %4278 = vmatprep.subr.bf16.mxu1 %v6153_v63 }
 0x516   : > { %4279 = vmatpush1.bf16.msra.mxu1 %v6151_v0 }
 0x517   : > { %4280 = vmatprep.subr.bf16.mxu1 %v6156_v1 }
 0x51a   : > { %4281 = vmatpush1.bf16.msra.mxu1 %v6154_v2 }
 0x51b   : > { %4282 = vmatprep.subr.bf16.mxu1 %v6159_v3 }
 0x51e   : > { %4283 = vmatpush1.bf16.msra.mxu1 %v6157_v4 }
 0x51f   : > { %4449 = vmatprep.subr.bf16.mxu1 %v4339_v17 }
 0x521   : > { %4285 = vmatmul.mubr.bf16.vlgmr.msra.gmra.mrb[28].mxu1 %v6646_v20 }
 0x522   : > { %4450 = vmatpush1.bf16.msra.mxu1 %v4338_v12 }
 0x523   : > { %4451 = vmatprep.subr.bf16.mxu1 %v4343_v58  ;;  %v6160_v58 = vld [vmem:[#allocation9 + $0x4] ss:$8 sps:$4 sm:$0xff]  }
 0x524   : > { %5221 = vmatprep.mubr.msk.bf16.mxu1 %vm4436_vm0, %v6160_v58 }
 0x526   : > { %4452 = vmatpush1.bf16.msra.mxu1 %v4342_v55 }
 0x527   : > { %4453 = vmatprep.subr.bf16.mxu1 %v4347_v46 }
 0x52a   : > { %4454 = vmatpush1.bf16.msra.mxu1 %v4346_v43 }
 0x52b   : > { %4455 = vmatprep.subr.bf16.mxu1 %v4351_v42 }
 0x52e   : > { %4456 = vmatpush1.bf16.msra.mxu1 %v4350_v36 }
 0x534   : > { %v4157_v20 = vpop.f32.mrb[16].mxu1 }
 0x535   : > { %v4159_v5 = vpop.f32.mrb[17].mxu1 }
 0x536   : > { %v4161_v7 = vpop.f32.mrb[18].mxu1 }
 0x537   : > { %v4354_v9 = vpack.c.bf16 %v4161_v7, %v4157_v20  ;;  %v4163_v12 = vpop.f32.mrb[19].mxu1 }
 0x538   : > { %v4355_v14 = vpack.c.bf16 %v4163_v12, %v4159_v5 }
 0x53a   : > { %4457 = vmatprep.subr.bf16.mxu1 %v4355_v14 }
 0x53b   : > { %4458 = vmatpush1.bf16.msra.mxu1 %v4354_v9 }
 0x574   : > { %v4200_v17 = vpop.f32.mrb[20].mxu1 }
 0x575   : > { %v4202_v51 = vpop.f32.mrb[21].mxu1 }
 0x576   : > { %v4204_v52 = vpop.f32.mrb[22].mxu1 }
 0x577   : > { %v4358_v53 = vpack.c.bf16 %v4204_v52, %v4200_v17  ;;  %v4206_v55 = vpop.f32.mrb[23].mxu1 }
 0x578   : > { %v4359_v56 = vpack.c.bf16 %v4206_v55, %v4202_v51 }
 0x57a   : > { %4459 = vmatprep.subr.bf16.mxu1 %v4359_v56 }
 0x57b   : > { %4460 = vmatpush1.bf16.msra.mxu1 %v4358_v53 }
 0x5b4   : > { %v4243_v39 = vpop.f32.mrb[24].mxu1 }
 0x5b5   : > { %v4245_v40 = vpop.f32.mrb[25].mxu1 }
 0x5b6   : > { %v4247_v41 = vpop.f32.mrb[26].mxu1 }
 0x5b7   : > { %v4362_v43 = vpack.c.bf16 %v4247_v41, %v4243_v39  ;;  %v4249_v44 = vpop.f32.mrb[27].mxu1 }
 0x5b8   : > { %v4363_v46 = vpack.c.bf16 %v4249_v44, %v4245_v40 }
 0x5ba   : > { %4461 = vmatprep.subr.bf16.mxu1 %v4363_v46 }
 0x5bb   : > { %4462 = vmatpush1.bf16.msra.mxu1 %v4362_v43 }
 0x5f4   : > { %v4286_v11 = vpop.f32.mrb[28].mxu1 }
 0x5f5   : > { %v4288_v16 = vpop.f32.mrb[29].mxu1 }
 0x5f6   : > { %v4290_v19 = vpop.f32.mrb[30].mxu1 }
 0x5f7   : > { %v4366_v21 = vpack.c.bf16 %v4290_v19, %v4286_v11  ;;  %v4292_v23 = vpop.f32.mrb[31].mxu1 }
 0x5f8   : > { %v4367_v24 = vpack.c.bf16 %v4292_v23, %v4288_v16 }
 0x5fa   : > { %4463 = vmatprep.subr.bf16.mxu1 %v4367_v24 }
 0x5fb   : > { %4464 = vmatpush1.bf16.msra.mxu1 %v4366_v21 }
 0x5fc   : > { %4465 = vmatprep.subr.bf16.mxu1 %v4371_v18 }
 0x5ff   : > { %4466 = vmatpush1.bf16.msra.mxu1 %v4370_v13 }
 0x602   : > { %4482 = vmatmul.mubr.bf16.vlgmr.msra.gmra.mrb[32].mxu1 %v6162_v25 }
 0x603   : > { %5222 = vmatprep.mubr.msk.bf16.mxu1 %vm4436_vm0, %v6163_v26 }
 0x60a   : > { %4492 = vmatmul.mubr.bf16.gmra.mrb[36].mxu1 %v6165_v27 }
 0x60b   : > { %5223 = vmatprep.mubr.msk.bf16.mxu1 %vm4436_vm0, %v6166_v28 }
 0x612   : > { %4502 = vmatmul.mubr.bf16.gmra.mrb[40].mxu1 %v6168_v29 }
 0x613   : > { %5224 = vmatprep.mubr.msk.bf16.mxu1 %vm4436_vm0, %v6169_v30 }
 0x61a   : > { %4512 = vmatmul.mubr.bf16.gmra.mrb[44].mxu1 %v6171_v8 }
 0x6d5   : > { %v4483_v15 = vpop.f32.mrb[32].mxu1 }
 0x6d6   : > { %4522 = vst [vmem:[%s6745_s23] sm:$0xff] %v4483_v15  ;;  %v4485_v6 = vpop.f32.mrb[33].mxu1 }
 0x6d7   : > { %4523 = vst [vmem:[%s6745_s23 + $0x8] sm:$0xff] %v4485_v6  ;;  %v4487_v10 = vpop.f32.mrb[34].mxu1 }
 0x6d8   : > { %4524 = vst [vmem:[%s6745_s23 + $0x10] sm:$0xff] %v4487_v10  ;;  %v4489_v13 = vpop.f32.mrb[35].mxu1 }
 0x6d9   : > { %4525 = vst [vmem:[%s6745_s23 + $0x18] sm:$0xff] %v4489_v13 }
 0x6dd   : > { %v4493_v18 = vpop.f32.mrb[36].mxu1 }
 0x6de   : > { %4526 = vst [vmem:[%s6745_s23 + $0x20] sm:$0xff] %v4493_v18  ;;  %v4495_v31 = vpop.f32.mrb[37].mxu1 }
 0x6df   : > { %4527 = vst [vmem:[%s6745_s23 + $0x28] sm:$0xff] %v4495_v31  ;;  %v4497_v32 = vpop.f32.mrb[38].mxu1 }
 0x6e0   : > { %4528 = vst [vmem:[%s6745_s23 + $0x30] sm:$0xff] %v4497_v32  ;;  %v4499_v22 = vpop.f32.mrb[39].mxu1 }
 0x6e1   : > { %4529 = vst [vmem:[%s6745_s23 + $0x38] sm:$0xff] %v4499_v22 }
 0x6e5   : > { %v4503_v33 = vpop.f32.mrb[40].mxu1 }
 0x6e6   : > { %4530 = vst [vmem:[%s6745_s23 + $0x40] sm:$0xff] %v4503_v33  ;;  %v4505_v34 = vpop.f32.mrb[41].mxu1 }
 0x6e7   : > { %4531 = vst [vmem:[%s6745_s23 + $0x48] sm:$0xff] %v4505_v34  ;;  %v4507_v35 = vpop.f32.mrb[42].mxu1 }
 0x6e8   : > { %4532 = vst [vmem:[%s6745_s23 + $0x50] sm:$0xff] %v4507_v35  ;;  %v4509_v36 = vpop.f32.mrb[43].mxu1 }
 0x6e9   : > { %4533 = vst [vmem:[%s6745_s23 + $0x58] sm:$0xff] %v4509_v36 }
 0x6ed   : > { %v4513_v37 = vpop.f32.mrb[44].mxu1 }
 0x6ee   : > { %4534 = vst [vmem:[%s6745_s23 + $0x60] sm:$0xff] %v4513_v37  ;;  %v4515_v38 = vpop.f32.mrb[45].mxu1 }
 0x6ef   : > { %4535 = vst [vmem:[%s6745_s23 + $0x68] sm:$0xff] %v4515_v38  ;;  %v4517_v42 = vpop.f32.mrb[46].mxu1 }
 0x6f0   : > { %4536 = vst [vmem:[%s6745_s23 + $0x70] sm:$0xff] %v4517_v42  ;;  %v4519_v45 = vpop.f32.mrb[47].mxu1 }
 0x6f1   : > { %4537 = vst [vmem:[%s6745_s23 + $0x78] sm:$0xff] %v4519_v45 }
 0x6f2   : > { %6299 = shalt.err (!%p6296_p4)
}
 0x6f3   : > { %s6300_s24 = scalar_lea.hbm %s6765_s28, 2048  ;;  %s6304_s26 = scalar_lea.hbm %s6818_s4, 4096 }
 0x6f4   : > { %p6301_p9 = scmp.ne.s32.totalorder %s6765_s28, %s6300_s24  ;;  %p6305_p8 = scmp.lt.u32.totalorder %s6765_s28, %s6818_s4 }
 0x6f5   : > { %p6306_p13 = scmp.lt.u32.totalorder %s6304_s26, %s6300_s24  ;;  %p6308_p10 = scmp.lt.u32.totalorder %s6300_s24, %s6765_s28 }
 0x6f6   : > { %p6302_p0 = pnand %p6301_p9, %p6547_p5 }
 0x6f7   : > { %p6307_p6 = por %p6306_p13, %p6305_p8 }
 0x6f8   : > { %p6303_p11 = pneg %p6302_p0 }
 0x6f9   : > { %p6309_p3 = por %p6308_p10, %p6307_p6 }
 0x6fb   : > { %p6310_p7 = pnand %p6309_p3, %p6303_p11 }
 0x6fd   : > { %6313 = shalt.err (!%p6310_p7)
}
 0x6fe   : > { %s6372_s23 = smov 256   ;;  %s6373_s9 = smov 16  }
 0x6ff   : > { %5274 = dma.vmem_to_hbm [thread:$0]  (%p6547_p5), %s6767_s13, 2048, %s6765_s28, %s4539_s19, %s6372_s23, %s6372_s23, %s6373_s9  }
 0x700 PF: > { %s4567_s7 = sand.u32 1, %s6348_s15   ;;  %p6839_p12 = scmp.ne.s32.totalorder %s6825_s22, 0 }
 0x701   : > { %p6840_p1 = scmp.ge.s32.totalorder %s6360_s18, 2  ;;  %s4568_s25 = scalar_lea.sflag [#allocation5], %s4567_s7 }
 0x703   : > { %p5291_p2 = pnand %p6840_p1, %p6839_p12 }
 0x705   : > { %6343 = dma.done.wait (!%p5291_p2), %s4568_s25, 2048  }
 0x706   : > { %6345 = vsyncadd (!%p5291_p2), %s4568_s25, 4294965248  ;;  %p19_p4 = scmp.ge.s32.totalorder %s6512_s27, 4   ;;  %s6841_s15 = smov %s6352_s16 }
 0x707   : > { %s6842_s16 = smov %s6356_s17  ;;  %s6843_s17 = smov %s6543_s11 }
 0x708   : > { %s6844_s18 = smov %s6512_s27  ;;  %21 = sbr.rel (!%p19_p4) target bundleno = 7 (0x7), region = 93 }
 0x70f   :  { %4573 = vsyncpa [#allocation4], 1 }
 0x710   :  { %4575 = vsyncpa [#allocation4 + $0x1], 1 }
 0x711   :  { %4576 = vsyncpa [#allocation7], 1 }
 0x712   :  { %4577 = vsyncpa [#allocation10], 1 }
 0x713   :  { %4578 = vsyncpa [#allocation5], 1 }
 0x714   :  { %4580 = vsyncpa [#allocation5 + $0x1], 1 }

</bundles_post_ra>
